<compile_context>
chip_gen: v5e
topology: v5e:2x2
jax: 0.10.0
libtpu: 0.0.40
codegen_flags: <defaults>
</compile_context>

<pallas_src>
import jax
import jax.numpy as jnp
from jax.experimental import pallas as pl
from jax.experimental.pallas import tpu as pltpu

HIDDEN = 128
LANE = 128

# Flipped to False (once) if this jax build rejects pl.Buffered(1) for the
# resident weight blocks; everything else is unaffected.
_SINGLE_BUFFER_WEIGHTS = True


def _round_up(n, m):
    return ((n + m - 1) // m) * m


# -----------------------------------------------------------------------------
# Kernel
# -----------------------------------------------------------------------------
def actor_kernel(x_ref, w1_ref, b1_ref, w2_ref, b2_ref, w3_ref, b3_ref, o_ref):
    # Cast x to the matmul dtype on the VPU (hides under MXU slack) rather than
    # paying a separate wrapper-side XLA cast + bf16 re-read.
    x = x_ref[...].astype(w1_ref.dtype)
    h1 = jnp.dot(x, w1_ref[...], preferred_element_type=jnp.float32)      # MXU, f32 acc
    h1 = jnp.maximum(h1 + b1_ref[...], 0.0)                               # VPU, f32
    h2 = jnp.dot(h1.astype(w2_ref.dtype), w2_ref[...],
                 preferred_element_type=jnp.float32)
    h2 = jnp.maximum(h2 + b2_ref[...], 0.0)
    out = jnp.dot(h2.astype(w3_ref.dtype), w3_ref[...],
                  preferred_element_type=jnp.float32) + b3_ref[...]
    o_ref[...] = out.astype(o_ref.dtype)       # lane-dense (multiple-of-128) store


# -----------------------------------------------------------------------------
# One-time parameter preparation (hoisted out of the per-call hot path)
# -----------------------------------------------------------------------------
def init_actor_params(key, input_dim, action_dim, hidden=HIDDEN):
    """Deterministic synthetic init (Kaiming-uniform-ish like nn.Linear)."""
    keys = jax.random.split(key, 6)

    def linear(kw, kb, fan_in, fan_out):
        bound = 1.0 / jnp.sqrt(fan_in)
        w = jax.random.uniform(kw, (fan_in, fan_out), jnp.float32, -bound, bound)
        b = jax.random.uniform(kb, (1, fan_out), jnp.float32, -bound, bound)
        return w, b

    w1, b1 = linear(keys[0], keys[1], input_dim, hidden)
    w2, b2 = linear(keys[2], keys[3], hidden, hidden)
    w3, b3 = linear(keys[4], keys[5], hidden, action_dim)
    return {"w1": w1, "b1": b1, "w2": w2, "b2": b2, "w3": w3, "b3": b3}


def prepare_actor_params(params, matmul_dtype=jnp.bfloat16):
    """Cast matmul operands to bf16 and zero-pad w3/b3 to a 128-lane slab.
    Call once; reuse the result for every actor_forward call."""
    w1, b1, w2, b2, w3, b3 = (params[k] for k in ("w1", "b1", "w2", "b2", "w3", "b3"))
    hidden, act_dim = w3.shape
    out_pad = _round_up(act_dim, LANE)
    if out_pad != act_dim:
        w3 = jnp.zeros((hidden, out_pad), w3.dtype).at[:, :act_dim].set(w3)
        b3 = jnp.zeros((1, out_pad), b3.dtype).at[:, :act_dim].set(b3)
    return {
        "w1": w1.astype(matmul_dtype), "b1": b1.astype(jnp.float32),
        "w2": w2.astype(matmul_dtype), "b2": b2.astype(jnp.float32),
        "w3": w3.astype(matmul_dtype), "b3": b3.astype(jnp.float32),
        "act_dim": act_dim,
    }


# -----------------------------------------------------------------------------
# Forward wrapper
# -----------------------------------------------------------------------------
def _resident_spec(shape, single_buffer):
    # Constant index_map -> block stays resident in VMEM across grid steps.
    idx = lambda i: (0,) * len(shape)
    if single_buffer:
        # Weights never change across grid steps; skip the default double buffer.
        return pl.BlockSpec(shape, idx, pipeline_mode=pl.Buffered(1))
    return pl.BlockSpec(shape, idx)


def _launch(xp, w, tile_b, out_dtype, single_buffer):
    Bp, in_dim = xp.shape
    out_pad = w["w3"].shape[1]
    weights = (w["w1"], w["b1"], w["w2"], w["b2"], w["w3"], w["b3"])
    return pl.pallas_call(
        actor_kernel,
        out_shape=jax.ShapeDtypeStruct((Bp, out_pad), out_dtype),
        grid=(Bp // tile_b,),
        in_specs=[pl.BlockSpec((tile_b, in_dim), lambda i: (i, 0))]       # batch-tiled x
        + [_resident_spec(a.shape, single_buffer) for a in weights],
        out_specs=pl.BlockSpec((tile_b, out_pad), lambda i: (i, 0)),
        compiler_params=pltpu.CompilerParams(
            # Only matters when grid > 1 (large B): shards batch tiles across
            # v7x's two TensorCores; a no-op at grid=(1,) and on v5e/v6e.
            dimension_semantics=("parallel",),
        ),
    )(xp, *weights)


def actor_forward(x, prepped, *, tile_b=None, out_dtype=jnp.float32,
                  slice_output=True, max_tile_b=2048):
    """x: (B, input_dim) f32.  prepped: output of prepare_actor_params."""
    global _SINGLE_BUFFER_WEIGHTS
    B = x.shape[0]
    act_dim = prepped["act_dim"]

    if tile_b is None:
        # Small/medium B: single grid step (per-step overhead dominates here).
        # Large B: tile at max_tile_b (raise to 4-8K on v6e if desired; re-check
        # VMEM headroom on v7x's 64 MiB before pushing past ~16K rows/tile).
        tile_b = _round_up(B, 8) if B <= max_tile_b else max_tile_b
    Bp = _round_up(B, tile_b)
    xp = jnp.pad(x, ((0, Bp - B), (0, 0))) if Bp != B else x

    try:
        out = _launch(xp, prepped, tile_b, out_dtype, _SINGLE_BUFFER_WEIGHTS)
    except Exception:
        if not _SINGLE_BUFFER_WEIGHTS:
            raise
        _SINGLE_BUFFER_WEIGHTS = False       # pl.Buffered(1) unsupported: retry
        out = _launch(xp, prepped, tile_b, out_dtype, False)

    if slice_output:
        return out[:B, :act_dim]
    # Padded (Bp, out_pad) lane-dense slab; let a jitted consumer fuse its own slice.
    return out


# -----------------------------------------------------------------------------
# Pure-JAX reference (same bf16 MXU-boundary casts as the kernel)
# -----------------------------------------------------------------------------
def actor_ref(x, params, matmul_dtype=jnp.bfloat16):
    c = lambda a: a.astype(matmul_dtype)
    h1 = jnp.maximum(
        jnp.dot(c(x), c(params["w1"]), preferred_element_type=jnp.float32) + params["b1"], 0.0)
    h2 = jnp.maximum(
        jnp.dot(c(h1), c(params["w2"]), preferred_element_type=jnp.float32) + params["b2"], 0.0)
    return jnp.dot(c(h2), c(params["w3"]), preferred_element_type=jnp.float32) + params["b3"]


if __name__ == "__main__":
    # Non-trivial batch exercises the single-step path; input/action dims match
    # a TrafficJunction-style Actor head.
    batch, input_dim, action_dim = 200, 32, 8

    key = jax.random.PRNGKey(0)
    kx, kp = jax.random.split(key)
    x = jax.random.normal(kx, (batch, input_dim), jnp.float32)
    params = init_actor_params(kp, input_dim, action_dim)

    prepped = prepare_actor_params(params)            # one-time, hoisted weight prep
    out = jax.block_until_ready(actor_forward(x, prepped))

    ref = actor_ref(x, params)
    assert out.shape == (batch, action_dim), out.shape
    assert jnp.allclose(out, ref, atol=2e-3, rtol=2e-3), "mismatch vs reference"

    print("KERNEL_OK")
</pallas_src>

<mosaic_0001>
module attributes {stable_mosaic.version = 11 : i64} {
  func.func @actor_kernel(%arg0: i32, %arg1: memref<200x32xf32, #tpu.memory_space<vmem>>, %arg2: memref<32x128xbf16, #tpu.memory_space<vmem>>, %arg3: memref<1x128xf32, #tpu.memory_space<vmem>>, %arg4: memref<128x128xbf16, #tpu.memory_space<vmem>>, %arg5: memref<1x128xf32, #tpu.memory_space<vmem>>, %arg6: memref<128x128xbf16, #tpu.memory_space<vmem>>, %arg7: memref<1x128xf32, #tpu.memory_space<vmem>>, %arg8: memref<200x128xf32, #tpu.memory_space<vmem>>) attributes {dimension_semantics = [#tpu.dimension_semantics<parallel>], iteration_bounds = array<i64: 1>, scalar_prefetch = 0 : i64, scratch_operands = 0 : i64, tpu.core_type = #tpu.core_type<tc>, window_params = [{transform_indices = @transform_0, window_bounds = array<i64: 200, 32>}, {pipeline_mode = #tpu.pipeline_mode<synchronous>, transform_indices = @transform_1, window_bounds = array<i64: 32, 128>}, {pipeline_mode = #tpu.pipeline_mode<synchronous>, transform_indices = @transform_2, window_bounds = array<i64: 1, 128>}, {pipeline_mode = #tpu.pipeline_mode<synchronous>, transform_indices = @transform_3, window_bounds = array<i64: 128, 128>}, {pipeline_mode = #tpu.pipeline_mode<synchronous>, transform_indices = @transform_4, window_bounds = array<i64: 1, 128>}, {pipeline_mode = #tpu.pipeline_mode<synchronous>, transform_indices = @transform_5, window_bounds = array<i64: 128, 128>}, {pipeline_mode = #tpu.pipeline_mode<synchronous>, transform_indices = @transform_6, window_bounds = array<i64: 1, 128>}, {transform_indices = @transform_7, window_bounds = array<i64: 200, 128>}]} {
    %c0 = arith.constant 0 : index
    %c0_0 = arith.constant 0 : index
    %0 = vector.load %arg1[%c0, %c0_0] : memref<200x32xf32, #tpu.memory_space<vmem>>, vector<200x32xf32>
    %1 = arith.truncf %0 : vector<200x32xf32> to vector<200x32xbf16>
    %c0_1 = arith.constant 0 : index
    %c0_2 = arith.constant 0 : index
    %2 = vector.load %arg2[%c0_1, %c0_2] : memref<32x128xbf16, #tpu.memory_space<vmem>>, vector<32x128xbf16>
    %cst = arith.constant dense<0.000000e+00> : vector<200x128xf32>
    %3 = tpu.matmul %1, %2, %cst {dimension_numbers = #tpu.dot_dimension_numbers<[1], [0], [0], [1], [0, 0, 1, 1], [], []>} : vector<200x32xbf16>, vector<32x128xbf16>, vector<200x128xf32> -> vector<200x128xf32>
    %c0_3 = arith.constant 0 : index
    %c0_4 = arith.constant 0 : index
    %4 = vector.load %arg3[%c0_3, %c0_4] : memref<1x128xf32, #tpu.memory_space<vmem>>, vector<1x128xf32>
    %5 = vector.broadcast %4 : vector<1x128xf32> to vector<200x128xf32>
    %6 = arith.addf %3, %5 : vector<200x128xf32>
    %cst_5 = arith.constant 0.000000e+00 : f32
    %7 = vector.broadcast %cst_5 : f32 to vector<200x128xf32>
    %8 = arith.maximumf %6, %7 : vector<200x128xf32>
    %9 = arith.truncf %8 : vector<200x128xf32> to vector<200x128xbf16>
    %c0_6 = arith.constant 0 : index
    %c0_7 = arith.constant 0 : index
    %10 = vector.load %arg4[%c0_6, %c0_7] : memref<128x128xbf16, #tpu.memory_space<vmem>>, vector<128x128xbf16>
    %cst_8 = arith.constant dense<0.000000e+00> : vector<200x128xf32>
    %11 = tpu.matmul %9, %10, %cst_8 {dimension_numbers = #tpu.dot_dimension_numbers<[1], [0], [0], [1], [0, 0, 1, 1], [], []>} : vector<200x128xbf16>, vector<128x128xbf16>, vector<200x128xf32> -> vector<200x128xf32>
    %c0_9 = arith.constant 0 : index
    %c0_10 = arith.constant 0 : index
    %12 = vector.load %arg5[%c0_9, %c0_10] : memref<1x128xf32, #tpu.memory_space<vmem>>, vector<1x128xf32>
    %13 = vector.broadcast %12 : vector<1x128xf32> to vector<200x128xf32>
    %14 = arith.addf %11, %13 : vector<200x128xf32>
    %cst_11 = arith.constant 0.000000e+00 : f32
    %15 = vector.broadcast %cst_11 : f32 to vector<200x128xf32>
    %16 = arith.maximumf %14, %15 : vector<200x128xf32>
    %17 = arith.truncf %16 : vector<200x128xf32> to vector<200x128xbf16>
    %c0_12 = arith.constant 0 : index
    %c0_13 = arith.constant 0 : index
    %18 = vector.load %arg6[%c0_12, %c0_13] : memref<128x128xbf16, #tpu.memory_space<vmem>>, vector<128x128xbf16>
    %cst_14 = arith.constant dense<0.000000e+00> : vector<200x128xf32>
    %19 = tpu.matmul %17, %18, %cst_14 {dimension_numbers = #tpu.dot_dimension_numbers<[1], [0], [0], [1], [0, 0, 1, 1], [], []>} : vector<200x128xbf16>, vector<128x128xbf16>, vector<200x128xf32> -> vector<200x128xf32>
    %c0_15 = arith.constant 0 : index
    %c0_16 = arith.constant 0 : index
    %20 = vector.load %arg7[%c0_15, %c0_16] : memref<1x128xf32, #tpu.memory_space<vmem>>, vector<1x128xf32>
    %21 = vector.broadcast %20 : vector<1x128xf32> to vector<200x128xf32>
    %22 = arith.addf %19, %21 : vector<200x128xf32>
    %c0_17 = arith.constant 0 : index
    %c0_18 = arith.constant 0 : index
    %23 = vector.load %arg8[%c0_17, %c0_18] : memref<200x128xf32, #tpu.memory_space<vmem>>, vector<200x128xf32>
    tpu.vector_store %arg8[%c0_17, %c0_18], %22 {strides = array<i32>} : memref<200x128xf32, #tpu.memory_space<vmem>>, vector<200x128xf32>,
    return
  }
  func.func @transform_0(%arg0: i32) -> (i32, i32) {
    %c0_i32 = arith.constant 0 : i32
    %c0_i32_0 = arith.constant 0 : i32
    return %arg0, %c0_i32 : i32, i32
  }
  func.func @transform_1(%arg0: i32) -> (i32, i32) {
    %c0_i32 = arith.constant 0 : i32
    %c0_i32_0 = arith.constant 0 : i32
    %c0_i32_1 = arith.constant 0 : i32
    return %c0_i32, %c0_i32_0 : i32, i32
  }
  func.func @transform_2(%arg0: i32) -> (i32, i32) {
    %c0_i32 = arith.constant 0 : i32
    %c0_i32_0 = arith.constant 0 : i32
    %c0_i32_1 = arith.constant 0 : i32
    return %c0_i32, %c0_i32_0 : i32, i32
  }
  func.func @transform_3(%arg0: i32) -> (i32, i32) {
    %c0_i32 = arith.constant 0 : i32
    %c0_i32_0 = arith.constant 0 : i32
    %c0_i32_1 = arith.constant 0 : i32
    return %c0_i32, %c0_i32_0 : i32, i32
  }
  func.func @transform_4(%arg0: i32) -> (i32, i32) {
    %c0_i32 = arith.constant 0 : i32
    %c0_i32_0 = arith.constant 0 : i32
    %c0_i32_1 = arith.constant 0 : i32
    return %c0_i32, %c0_i32_0 : i32, i32
  }
  func.func @transform_5(%arg0: i32) -> (i32, i32) {
    %c0_i32 = arith.constant 0 : i32
    %c0_i32_0 = arith.constant 0 : i32
    %c0_i32_1 = arith.constant 0 : i32
    return %c0_i32, %c0_i32_0 : i32, i32
  }
  func.func @transform_6(%arg0: i32) -> (i32, i32) {
    %c0_i32 = arith.constant 0 : i32
    %c0_i32_0 = arith.constant 0 : i32
    %c0_i32_1 = arith.constant 0 : i32
    return %c0_i32, %c0_i32_0 : i32, i32
  }
  func.func @transform_7(%arg0: i32) -> (i32, i32) {
    %c0_i32 = arith.constant 0 : i32
    %c0_i32_0 = arith.constant 0 : i32
    return %arg0, %c0_i32 : i32, i32
  }
}

module attributes {stable_mosaic.version = 11 : i64} {
  func.func @actor_kernel(%arg0: i32, %arg1: memref<200x32xf32, #tpu.memory_space<vmem>>, %arg2: memref<32x128xbf16, #tpu.memory_space<vmem>>, %arg3: memref<1x128xf32, #tpu.memory_space<vmem>>, %arg4: memref<128x128xbf16, #tpu.memory_space<vmem>>, %arg5: memref<1x128xf32, #tpu.memory_space<vmem>>, %arg6: memref<128x128xbf16, #tpu.memory_space<vmem>>, %arg7: memref<1x128xf32, #tpu.memory_space<vmem>>, %arg8: memref<200x128xf32, #tpu.memory_space<vmem>>) attributes {dimension_semantics = [#tpu.dimension_semantics<parallel>], iteration_bounds = array<i64: 1>, scalar_prefetch = 0 : i64, scratch_operands = 0 : i64, tpu.core_type = #tpu.core_type<tc>, window_params = [{transform_indices = @transform_0, window_bounds = array<i64: 200, 32>}, {pipeline_mode = #tpu.pipeline_mode<synchronous>, transform_indices = @transform_1, window_bounds = array<i64: 32, 128>}, {pipeline_mode = #tpu.pipeline_mode<synchronous>, transform_indices = @transform_2, window_bounds = array<i64: 1, 128>}, {pipeline_mode = #tpu.pipeline_mode<synchronous>, transform_indices = @transform_3, window_bounds = array<i64: 128, 128>}, {pipeline_mode = #tpu.pipeline_mode<synchronous>, transform_indices = @transform_4, window_bounds = array<i64: 1, 128>}, {pipeline_mode = #tpu.pipeline_mode<synchronous>, transform_indices = @transform_5, window_bounds = array<i64: 128, 128>}, {pipeline_mode = #tpu.pipeline_mode<synchronous>, transform_indices = @transform_6, window_bounds = array<i64: 1, 128>}, {transform_indices = @transform_7, window_bounds = array<i64: 200, 128>}]} {
    %c0 = arith.constant 0 : index
    %c0_0 = arith.constant 0 : index
    %0 = vector.load %arg1[%c0, %c0_0] : memref<200x32xf32, #tpu.memory_space<vmem>>, vector<200x32xf32>
    %1 = arith.truncf %0 : vector<200x32xf32> to vector<200x32xbf16>
    %c0_1 = arith.constant 0 : index
    %c0_2 = arith.constant 0 : index
    %2 = vector.load %arg2[%c0_1, %c0_2] : memref<32x128xbf16, #tpu.memory_space<vmem>>, vector<32x128xbf16>
    %cst = arith.constant dense<0.000000e+00> : vector<200x128xf32>
    %3 = tpu.matmul %1, %2, %cst {dimension_numbers = #tpu.dot_dimension_numbers<[1], [0], [0], [1], [0, 0, 1, 1], [], []>} : vector<200x32xbf16>, vector<32x128xbf16>, vector<200x128xf32> -> vector<200x128xf32>
    %c0_3 = arith.constant 0 : index
    %c0_4 = arith.constant 0 : index
    %4 = vector.load %arg3[%c0_3, %c0_4] : memref<1x128xf32, #tpu.memory_space<vmem>>, vector<1x128xf32>
    %5 = vector.broadcast %4 : vector<1x128xf32> to vector<200x128xf32>
    %6 = arith.addf %3, %5 : vector<200x128xf32>
    %cst_5 = arith.constant 0.000000e+00 : f32
    %7 = vector.broadcast %cst_5 : f32 to vector<200x128xf32>
    %8 = arith.maximumf %6, %7 : vector<200x128xf32>
    %9 = arith.truncf %8 : vector<200x128xf32> to vector<200x128xbf16>
    %c0_6 = arith.constant 0 : index
    %c0_7 = arith.constant 0 : index
    %10 = vector.load %arg4[%c0_6, %c0_7] : memref<128x128xbf16, #tpu.memory_space<vmem>>, vector<128x128xbf16>
    %cst_8 = arith.constant dense<0.000000e+00> : vector<200x128xf32>
    %11 = tpu.matmul %9, %10, %cst_8 {dimension_numbers = #tpu.dot_dimension_numbers<[1], [0], [0], [1], [0, 0, 1, 1], [], []>} : vector<200x128xbf16>, vector<128x128xbf16>, vector<200x128xf32> -> vector<200x128xf32>
    %c0_9 = arith.constant 0 : index
    %c0_10 = arith.constant 0 : index
    %12 = vector.load %arg5[%c0_9, %c0_10] : memref<1x128xf32, #tpu.memory_space<vmem>>, vector<1x128xf32>
    %13 = vector.broadcast %12 : vector<1x128xf32> to vector<200x128xf32>
    %14 = arith.addf %11, %13 : vector<200x128xf32>
    %cst_11 = arith.constant 0.000000e+00 : f32
    %15 = vector.broadcast %cst_11 : f32 to vector<200x128xf32>
    %16 = arith.maximumf %14, %15 : vector<200x128xf32>
    %17 = arith.truncf %16 : vector<200x128xf32> to vector<200x128xbf16>
    %c0_12 = arith.constant 0 : index
    %c0_13 = arith.constant 0 : index
    %18 = vector.load %arg6[%c0_12, %c0_13] : memref<128x128xbf16, #tpu.memory_space<vmem>>, vector<128x128xbf16>
    %cst_14 = arith.constant dense<0.000000e+00> : vector<200x128xf32>
    %19 = tpu.matmul %17, %18, %cst_14 {dimension_numbers = #tpu.dot_dimension_numbers<[1], [0], [0], [1], [0, 0, 1, 1], [], []>} : vector<200x128xbf16>, vector<128x128xbf16>, vector<200x128xf32> -> vector<200x128xf32>
    %c0_15 = arith.constant 0 : index
    %c0_16 = arith.constant 0 : index
    %20 = vector.load %arg7[%c0_15, %c0_16] : memref<1x128xf32, #tpu.memory_space<vmem>>, vector<1x128xf32>
    %21 = vector.broadcast %20 : vector<1x128xf32> to vector<200x128xf32>
    %22 = arith.addf %19, %21 : vector<200x128xf32>
    %c0_17 = arith.constant 0 : index
    %c0_18 = arith.constant 0 : index
    %23 = vector.load %arg8[%c0_17, %c0_18] : memref<200x128xf32, #tpu.memory_space<vmem>>, vector<200x128xf32>
    tpu.vector_store %arg8[%c0_17, %c0_18], %22 {strides = array<i32>} : memref<200x128xf32, #tpu.memory_space<vmem>>, vector<200x128xf32>,
    return
  }
  func.func @transform_0(%arg0: i32) -> (i32, i32) {
    %c0_i32 = arith.constant 0 : i32
    %c0_i32_0 = arith.constant 0 : i32
    return %arg0, %c0_i32 : i32, i32
  }
  func.func @transform_1(%arg0: i32) -> (i32, i32) {
    %c0_i32 = arith.constant 0 : i32
    %c0_i32_0 = arith.constant 0 : i32
    %c0_i32_1 = arith.constant 0 : i32
    return %c0_i32, %c0_i32_0 : i32, i32
  }
  func.func @transform_2(%arg0: i32) -> (i32, i32) {
    %c0_i32 = arith.constant 0 : i32
    %c0_i32_0 = arith.constant 0 : i32
    %c0_i32_1 = arith.constant 0 : i32
    return %c0_i32, %c0_i32_0 : i32, i32
  }
  func.func @transform_3(%arg0: i32) -> (i32, i32) {
    %c0_i32 = arith.constant 0 : i32
    %c0_i32_0 = arith.constant 0 : i32
    %c0_i32_1 = arith.constant 0 : i32
    return %c0_i32, %c0_i32_0 : i32, i32
  }
  func.func @transform_4(%arg0: i32) -> (i32, i32) {
    %c0_i32 = arith.constant 0 : i32
    %c0_i32_0 = arith.constant 0 : i32
    %c0_i32_1 = arith.constant 0 : i32
    return %c0_i32, %c0_i32_0 : i32, i32
  }
  func.func @transform_5(%arg0: i32) -> (i32, i32) {
    %c0_i32 = arith.constant 0 : i32
    %c0_i32_0 = arith.constant 0 : i32
    %c0_i32_1 = arith.constant 0 : i32
    return %c0_i32, %c0_i32_0 : i32, i32
  }
  func.func @transform_6(%arg0: i32) -> (i32, i32) {
    %c0_i32 = arith.constant 0 : i32
    %c0_i32_0 = arith.constant 0 : i32
    %c0_i32_1 = arith.constant 0 : i32
    return %c0_i32, %c0_i32_0 : i32, i32
  }
  func.func @transform_7(%arg0: i32) -> (i32, i32) {
    %c0_i32 = arith.constant 0 : i32
    %c0_i32_0 = arith.constant 0 : i32
    return %arg0, %c0_i32 : i32, i32
  }
}

</mosaic_0001>

<bundles_post_ra>
// kernel: tpu_custom_call.1
= control target key start
LH: loop header
LB: loop body
LE: loop exit
PB: predicated region body
PF: predicated region fallthrough
CT: control target
= control target key end

     0   :  { %s1031_s0 = inlined_call_operand.vmem [shape: f32[200,32], index: 0, kind: input, shape index: {}]   ;;  %s1032_s1 = inlined_call_operand.vmem [shape: bf16[32,128], index: 1, kind: input, shape index: {}]   ;;  %s1033_s2 = inlined_call_operand.vmem [shape: f32[1,128], index: 2, kind: input, shape index: {}]   ;;  %s1034_s3 = inlined_call_operand.vmem [shape: bf16[128,128], index: 3, kind: input, shape index: {}]   ;;  %s1035_s4 = inlined_call_operand.vmem [shape: f32[1,128], index: 4, kind: input, shape index: {}]   ;;  %s1036_s5 = inlined_call_operand.vmem [shape: bf16[128,128], index: 5, kind: input, shape index: {}]   ;;  %s1037_s6 = inlined_call_operand.vmem [shape: f32[1,128], index: 6, kind: input, shape index: {}]   ;;  %s1038_s7 = inlined_call_operand.hbm [shape: f32[200,128], index: 7, kind: output, shape index: {}]  }
   0x1   :  { %v686_v0 = vld [vmem:[%s1032_s1 + $0x8] sm:$0xff]  ;;  %v685_v1 = vld [vmem:[%s1032_s1] sm:$0xff] }
   0x2   :  { %132 = vmatpush.bf16.msra.mxu0 %v686_v0  ;;  %v28_v2 = vld [vmem:[%s1031_s0] sm:$0xff]  ;;  %v29_v3 = vld [vmem:[%s1031_s0 + $0x8] sm:$0xff]  ;;  %703 = vmatpush.bf16.msra.mxu3 %v686_v0 }
   0x3   :  { %12 = vsyncpa [#allocation3], 0  ;;  %v53_v4 = vpack.c.bf16 %v29_v3, %v28_v2  ;;  %vm86_vm0 = vcmask 261120   ;;  %v30_v5 = vld [vmem:[%s1031_s0 + $0x10] sm:$0xff]  ;;  %v31_v6 = vld [vmem:[%s1031_s0 + $0x18] sm:$0xff]  ;;  %s754_s17 = smov 128  }
   0x4   :  { %v54_v7 = vpack.c.bf16 %v31_v6, %v30_v5  ;;  %v32_v8 = vld [vmem:[%s1031_s0 + $0x20] sm:$0xff]  ;;  %v33_v9 = vld [vmem:[%s1031_s0 + $0x28] sm:$0xff]  ;;  %v34_v11 = vld [vmem:[%s1031_s0 + $0x30] sm:$0xff]  ;;  %s755_s18 = smov 8  }
   0x5   :  { %v55_v10 = vpack.c.bf16 %v33_v9, %v32_v8  ;;  %v35_v12 = vld [vmem:[%s1031_s0 + $0x38] sm:$0xff]  ;;  %v36_v14 = vld [vmem:[%s1031_s0 + $0x40] sm:$0xff]  ;;  %v37_v15 = vld [vmem:[%s1031_s0 + $0x48] sm:$0xff] }
   0x6   :  { %133 = vmatpush.bf16.msra.mxu0 %v685_v1  ;;  %704 = vmatpush.bf16.msra.mxu3 %v685_v1  ;;  %v56_v13 = vpack.c.bf16 %v35_v12, %v34_v11  ;;  %v57_v16 = vpack.c.bf16 %v37_v15, %v36_v14  ;;  %v694_v17 = vld [vmem:[%s1034_s3 + $0x38] sm:$0xff]  ;;  %v38_v18 = vld [vmem:[%s1031_s0 + $0x50] sm:$0xff]  ;;  %v692_v22 = vld [vmem:[%s1034_s3 + $0x28] sm:$0xff] }
   0x7   :  { %305 = vmatpush.bf16.msra.mxu1 %v694_v17  ;;  %v39_v19 = vld [vmem:[%s1031_s0 + $0x58] sm:$0xff]  ;;  %v693_v21 = vld [vmem:[%s1034_s3 + $0x30] sm:$0xff]  ;;  %v691_v23 = vld [vmem:[%s1034_s3 + $0x20] sm:$0xff] }
   0x8   :  { %v58_v20 = vpack.c.bf16 %v39_v19, %v38_v18  ;;  %v40_v24 = vld [vmem:[%s1031_s0 + $0x60] sm:$0xff]  ;;  %v41_v25 = vld [vmem:[%s1031_s0 + $0x68] sm:$0xff]  ;;  %v690_v26 = vld [vmem:[%s1034_s3 + $0x18] sm:$0xff] }
   0x9   :  { %608 = vmatmul.msk.bf16.vlgmr.msra.gmra.mxu0 %vm86_vm0, %v53_v4  ;;  %v59_v27 = vpack.c.bf16 %v41_v25, %v40_v24  ;;  %v689_v28 = vld [vmem:[%s1034_s3 + $0x10] sm:$0xff]  ;;  %v688_v29 = vld [vmem:[%s1034_s3 + $0x8] sm:$0xff]  ;;  %v687_v30 = vld [vmem:[%s1034_s3] sm:$0xff] }
   0xa   :  { %705 = vmatpush.bf16.msrb.mxu3 %v694_v17  ;;  %v42_v31 = vld [vmem:[%s1031_s0 + $0x70] sm:$0xff]  ;;  %v43_v32 = vld [vmem:[%s1031_s0 + $0x78] sm:$0xff]  ;;  %v44_v34 = vld [vmem:[%s1031_s0 + $0x80] sm:$0xff] }
   0xb   :  { %306 = vmatpush.bf16.msra.mxu1 %v693_v21  ;;  %v60_v33 = vpack.c.bf16 %v43_v32, %v42_v31  ;;  %v45_v35 = vld [vmem:[%s1031_s0 + $0x88] sm:$0xff]  ;;  %v50_v38 = vld [vmem:[%s1031_s0 + $0xb0] sm:$0xff]  ;;  %v51_v39 = vld [vmem:[%s1031_s0 + $0xb8] sm:$0xff] }
   0xc   :  { %v61_v36 = vpack.c.bf16 %v45_v35, %v44_v34  ;;  %v897_v40 = vld [vmem:[%s1033_s2] ss:$0 sm:$0xff]  ;;  %v64_v41 = vpack.c.bf16 %v51_v39, %v50_v38  ;;  %v46_v47 = vld [vmem:[%s1031_s0 + $0x90] sm:$0xff]  ;;  %v47_v48 = vld [vmem:[%s1031_s0 + $0x98] sm:$0xff]  ;;  %s588_s2 = sshll.u32 %s1038_s7, 4  ;;  %s589_s2 = int_to_ptr.hbm [resolvable:$true] %s588_s2 }
   0xd   :  { %v62_v50 = vpack.c.bf16 %v47_v48, %v46_v47  ;;  %v48_v57 = vld [vmem:[%s1031_s0 + $0xa0] sm:$0xff]  ;;  %v49_v58 = vld [vmem:[%s1031_s0 + $0xa8] sm:$0xff]  ;;  %v702_v24 = vld [vmem:[%s1036_s5 + $0x38] sm:$0xff] }
   0xe   :  { %706 = vmatpush.bf16.msrb.mxu3 %v693_v21  ;;  %v63_v60 = vpack.c.bf16 %v49_v58, %v48_v57  ;;  %v52_v62 = vld [vmem:[%s1031_s0 + $0xc0] sm:$0xff]  ;;  %484 = vmatpush.bf16.msra.mxu2 %v702_v24  ;;  %v698_v35 = vld [vmem:[%s1036_s5 + $0x18] sm:$0xff]  ;;  %v697_v39 = vld [vmem:[%s1036_s5 + $0x10] sm:$0xff] }
   0xf   :  { %307 = vmatpush.bf16.msra.mxu1 %v692_v22  ;;  %619 = vmatmul.msk.bf16.vlgmr.msra.gmra.mxu3 %vm86_vm0, %v64_v41  ;;  %v65_v63 = vpack.c.bf16 %v52_v62, %v52_v62  ;;  %v699_v31 = vld [vmem:[%s1036_s5 + $0x20] sm:$0xff] }
  0x10   :  { %v964_v58 = vld [vmem:[%s1035_s4] ss:$0 sm:$0xff] }
  0x12   :  { %707 = vmatpush.bf16.msrb.mxu3 %v692_v22 }
  0x13   :  { %308 = vmatpush.bf16.msra.mxu1 %v691_v23 }
  0x16   :  { %708 = vmatpush.bf16.msrb.mxu3 %v691_v23 }
  0x17   :  { %309 = vmatpush.bf16.msra.mxu1 %v690_v26 }
  0x19   :  { %609 = vmatmul.msk.bf16.gmra.mxu0 %vm86_vm0, %v54_v7 }
  0x1a   :  { %709 = vmatpush.bf16.msrb.mxu3 %v690_v26 }
  0x1b   :  { %310 = vmatpush.bf16.msra.mxu1 %v689_v28 }
  0x1e   :  { %710 = vmatpush.bf16.msrb.mxu3 %v689_v28  ;;  %v701_v28 = vld [vmem:[%s1036_s5 + $0x30] sm:$0xff] }
  0x1f   :  { %311 = vmatpush.bf16.msra.mxu1 %v688_v29  ;;  %620 = vmatmul.msk.bf16.gmra.mxu3 %vm86_vm0, %v65_v63 }
  0x20   :  { %485 = vmatpush.bf16.msra.mxu2 %v701_v28 }
  0x22   :  { %711 = vmatpush.bf16.msrb.mxu3 %v688_v29 }
  0x23   :  { %312 = vmatpush.bf16.msra.mxu1 %v687_v30 }
  0x26   :  { %712 = vmatpush.bf16.msrb.mxu3 %v687_v30  ;;  %v700_v30 = vld [vmem:[%s1036_s5 + $0x28] sm:$0xff] }
  0x27   :  { %486 = vmatpush.bf16.msra.mxu2 %v700_v30 }
  0x29   :  { %610 = vmatmul.msk.bf16.gmra.mxu0 %vm86_vm0, %v55_v10 }
  0x2a   :  { %713 = vmatpush.bf16.msra.mxu3 %v702_v24 }
  0x2b   :  { %487 = vmatpush.bf16.msra.mxu2 %v699_v31 }
  0x2e   :  { %714 = vmatpush.bf16.msra.mxu3 %v701_v28 }
  0x2f   :  { %488 = vmatpush.bf16.msra.mxu2 %v698_v35 }
  0x32   :  { %715 = vmatpush.bf16.msra.mxu3 %v700_v30 }
  0x33   :  { %489 = vmatpush.bf16.msra.mxu2 %v697_v39 }
  0x36   :  { %716 = vmatpush.bf16.msra.mxu3 %v699_v31 }
  0x39   :  { %611 = vmatmul.msk.bf16.gmra.mxu0 %vm86_vm0, %v56_v13 }
  0x3a   :  { %717 = vmatpush.bf16.msra.mxu3 %v698_v35 }
  0x3e   :  { %718 = vmatpush.bf16.msra.mxu3 %v697_v39 }
  0x49   :  { %612 = vmatmul.msk.bf16.gmra.mxu0 %vm86_vm0, %v57_v16 }
  0x59   :  { %613 = vmatmul.msk.bf16.gmra.mxu0 %vm86_vm0, %v58_v20 }
  0x69   :  { %614 = vmatmul.msk.bf16.gmra.mxu0 %vm86_vm0, %v59_v27 }
  0x79   :  { %615 = vmatmul.msk.bf16.gmra.mxu0 %vm86_vm0, %v60_v33 }
  0x86   :  { %v135_v37 = vpop.f32.mrf.mxu0 }
  0x87   :  { %v136_v42 = vadd.f32 %v897_v40, %v135_v37 }
  0x89   :  { %616 = vmatmul.msk.bf16.gmra.mxu0 %vm86_vm0, %v61_v36  ;;  %v199_v45 = vmax.f32 %v136_v42, 0.0  ;;  %v696_v42 = vld [vmem:[%s1036_s5 + $0x8] sm:$0xff] }
  0x8a   :  { %490 = vmatpush.bf16.msra.mxu2 %v696_v42  ;;  %719 = vmatpush.bf16.msra.mxu3 %v696_v42 }
  0x8e   :  { %v137_v43 = vpop.f32.mrf.mxu0 }
  0x8f   :  { %v138_v44 = vadd.f32 %v897_v40, %v137_v43  ;;  %v695_v43 = vld [vmem:[%s1036_s5] sm:$0xff] }
  0x90   :  { %491 = vmatpush.bf16.msra.mxu2 %v695_v43  ;;  %720 = vmatpush.bf16.msra.mxu3 %v695_v43 }
  0x91   :  { %v200_v46 = vmax.f32 %v138_v44, 0.0 }
  0x92   :  { %v190_v63 = vpop.f32.mrf.mxu3 }
  0x93   :  { %v224_v49 = vpack.c.bf16 %v200_v46, %v199_v45 }
  0x95   :  { %313 = vmatmul.bf16.vlgmr.msra.gmra.mxu1 %v224_v49 }
  0x96   :  { %v140_v51 = vpop.f32.mrf.mxu0 }
  0x97   :  { %v141_v52 = vadd.f32 %v897_v40, %v140_v51 }
  0x99   :  { %617 = vmatmul.msk.bf16.gmra.mxu0 %vm86_vm0, %v62_v50  ;;  %v201_v55 = vmax.f32 %v141_v52, 0.0 }
  0x9e   :  { %v142_v53 = vpop.f32.mrf.mxu0 }
  0x9f   :  { %v143_v54 = vadd.f32 %v897_v40, %v142_v53 }
  0xa1   :  { %v202_v56 = vmax.f32 %v143_v54, 0.0 }
  0xa3   :  { %v225_v59 = vpack.c.bf16 %v202_v56, %v201_v55 }
  0xa5   :  { %318 = vmatmul.bf16.gmra.mxu1 %v225_v59 }
  0xa6   :  { %v145_v61 = vpop.f32.mrf.mxu0 }
  0xa7   :  { %v146_v0 = vadd.f32 %v897_v40, %v145_v61 }
  0xa9   :  { %618 = vmatmul.msk.bf16.gmra.mxu0 %vm86_vm0, %v63_v60  ;;  %v203_v3 = vmax.f32 %v146_v0, 0.0 }
  0xae   :  { %v147_v1 = vpop.f32.mrf.mxu0 }
  0xaf   :  { %v148_v2 = vadd.f32 %v897_v40, %v147_v1 }
  0xb1   :  { %v204_v4 = vmax.f32 %v148_v2, 0.0 }
  0xb3   :  { %v226_v5 = vpack.c.bf16 %v204_v4, %v203_v3 }
  0xb5   :  { %323 = vmatmul.bf16.gmra.mxu1 %v226_v5 }
  0xb6   :  { %v150_v6 = vpop.f32.mrf.mxu0 }
  0xb7   :  { %v151_v7 = vadd.f32 %v897_v40, %v150_v6 }
  0xb9   :  { %v205_v10 = vmax.f32 %v151_v7, 0.0 }
  0xbe   :  { %v152_v8 = vpop.f32.mrf.mxu0 }
  0xbf   :  { %v153_v9 = vadd.f32 %v897_v40, %v152_v8 }
  0xc1   :  { %v206_v11 = vmax.f32 %v153_v9, 0.0 }
  0xc3   :  { %v227_v12 = vpack.c.bf16 %v206_v11, %v205_v10  ;;  %v192_v11 = vpop.f32.mrf.mxu3 }
  0xc4   :  { %v193_v30 = vadd.f32 %v897_v40, %v192_v11 }
  0xc5   :  { %328 = vmatmul.bf16.gmra.mxu1 %v227_v12 }
  0xc6   :  { %v155_v13 = vpop.f32.mrf.mxu0  ;;  %v222_v35 = vmax.f32 %v193_v30, 0.0 }
  0xc7   :  { %v156_v14 = vadd.f32 %v897_v40, %v155_v13 }
  0xc9   :  { %v207_v17 = vmax.f32 %v156_v14, 0.0 }
  0xce   :  { %v157_v15 = vpop.f32.mrf.mxu0 }
  0xcf   :  { %v158_v16 = vadd.f32 %v897_v40, %v157_v15 }
  0xd1   :  { %v208_v18 = vmax.f32 %v158_v16, 0.0 }
  0xd3   :  { %v228_v19 = vpack.c.bf16 %v208_v18, %v207_v17 }
  0xd5   :  { %333 = vmatmul.bf16.gmra.mxu1 %v228_v19  ;;  %v195_v19 = vpop.f32.mrf.mxu3 }
  0xd6   :  { %v160_v20 = vpop.f32.mrf.mxu0 }
  0xd7   :  { %v161_v21 = vadd.f32 %v897_v40, %v160_v20 }
  0xd9   :  { %v209_v25 = vmax.f32 %v161_v21, 0.0 }
  0xde   :  { %v162_v22 = vpop.f32.mrf.mxu0 }
  0xdf   :  { %v163_v23 = vadd.f32 %v897_v40, %v162_v22 }
  0xe1   :  { %v210_v26 = vmax.f32 %v163_v23, 0.0 }
  0xe3   :  { %v229_v27 = vpack.c.bf16 %v210_v26, %v209_v25  ;;  %v197_v26 = vpop.f32.mrf.mxu3 }
  0xe5   :  { %338 = vmatmul.bf16.gmra.mxu1 %v229_v27 }
  0xe6   :  { %v165_v29 = vpop.f32.mrf.mxu0 }
  0xe7   :  { %v166_v32 = vadd.f32 %v897_v40, %v165_v29  ;;  %v191_v29 = vadd.f32 %v897_v40, %v190_v63 }
  0xe9   :  { %v211_v36 = vmax.f32 %v166_v32, 0.0 }
  0xee   :  { %v167_v33 = vpop.f32.mrf.mxu0 }
  0xef   :  { %v168_v34 = vadd.f32 %v897_v40, %v167_v33 }
  0xf1   :  { %v212_v37 = vmax.f32 %v168_v34, 0.0  ;;  %v221_v34 = vmax.f32 %v191_v29, 0.0 }
  0xf3   :  { %v230_v38 = vpack.c.bf16 %v212_v37, %v211_v36 }
  0xf5   :  { %343 = vmatmul.bf16.gmra.mxu1 %v230_v38  ;;  %v235_v38 = vpack.c.bf16 %v222_v35, %v221_v34 }
  0xf6   :  { %v170_v41 = vpop.f32.mrf.mxu0 }
  0xf7   :  { %v171_v44 = vadd.f32 %v897_v40, %v170_v41  ;;  %v196_v41 = vadd.f32 %v897_v40, %v195_v19 }
  0xf9   :  { %v213_v47 = vmax.f32 %v171_v44, 0.0 }
  0xfe   :  { %v172_v45 = vpop.f32.mrf.mxu0 }
  0xff   :  { %v173_v46 = vadd.f32 %v897_v40, %v172_v45 }
 0x101   :  { %v214_v48 = vmax.f32 %v173_v46, 0.0  ;;  %v223_v46 = vmax.f32 %v196_v41, 0.0 }
 0x103   :  { %v231_v49 = vpack.c.bf16 %v214_v48, %v213_v47  ;;  %v236_v48 = vpack.c.bf16 %v223_v46, %v223_v46 }
 0x105   :  { %348 = vmatmul.bf16.gmra.mxu1 %v231_v49 }
 0x106   :  { %v175_v50 = vpop.f32.mrf.mxu0 }
 0x107   :  { %v176_v51 = vadd.f32 %v897_v40, %v175_v50 }
 0x109   :  { %v215_v54 = vmax.f32 %v176_v51, 0.0 }
 0x10e   :  { %v177_v52 = vpop.f32.mrf.mxu0 }
 0x10f   :  { %v178_v53 = vadd.f32 %v897_v40, %v177_v52 }
 0x111   :  { %v216_v55 = vmax.f32 %v178_v53, 0.0 }
 0x112   :  { %v314_v56 = vpop.f32.mrf.mxu1 }
 0x113   :  { %v232_v57 = vpack.c.bf16 %v216_v55, %v215_v54  ;;  %v315_v60 = vadd.f32 %v964_v58, %v314_v56 }
 0x115   :  { %353 = vmatmul.bf16.gmra.mxu1 %v232_v57  ;;  %v378_v0 = vmax.f32 %v315_v60, 0.0 }
 0x116   :  { %v180_v59 = vpop.f32.mrf.mxu0 }
 0x117   :  { %v181_v1 = vadd.f32 %v897_v40, %v180_v59 }
 0x119   :  { %v217_v6 = vmax.f32 %v181_v1, 0.0 }
 0x11a   :  { %v316_v61 = vpop.f32.mrf.mxu1 }
 0x11b   :  { %v317_v62 = vadd.f32 %v964_v58, %v316_v61 }
 0x11d   :  { %v379_v2 = vmax.f32 %v317_v62, 0.0 }
 0x11e   :  { %v182_v3 = vpop.f32.mrf.mxu0 }
 0x11f   :  { %v183_v4 = vadd.f32 %v897_v40, %v182_v3  ;;  %v403_v5 = vpack.c.bf16 %v379_v2, %v378_v0 }
 0x121   :  { %v218_v7 = vmax.f32 %v183_v4, 0.0  ;;  %492 = vmatmul.bf16.vlgmr.msra.gmra.mxu2 %v403_v5 }
 0x122   :  { %v319_v8 = vpop.f32.mrf.mxu1 }
 0x123   :  { %v233_v9 = vpack.c.bf16 %v218_v7, %v217_v6  ;;  %v320_v12 = vadd.f32 %v964_v58, %v319_v8 }
 0x125   :  { %358 = vmatmul.bf16.gmra.mxu1 %v233_v9  ;;  %v380_v15 = vmax.f32 %v320_v12, 0.0 }
 0x126   :  { %v185_v10 = vpop.f32.mrf.mxu0 }
 0x127   :  { %v186_v16 = vadd.f32 %v897_v40, %v185_v10 }
 0x129   :  { %v219_v22 = vmax.f32 %v186_v16, 0.0 }
 0x12a   :  { %v321_v13 = vpop.f32.mrf.mxu1 }
 0x12b   :  { %v322_v14 = vadd.f32 %v964_v58, %v321_v13 }
 0x12d   :  { %v381_v17 = vmax.f32 %v322_v14, 0.0 }
 0x12e   :  { %v187_v18 = vpop.f32.mrf.mxu0 }
 0x12f   :  { %v188_v20 = vadd.f32 %v897_v40, %v187_v18  ;;  %v404_v21 = vpack.c.bf16 %v381_v17, %v380_v15 }
 0x131   :  { %v220_v23 = vmax.f32 %v188_v20, 0.0  ;;  %497 = vmatmul.bf16.gmra.mxu2 %v404_v21  ;;  %v994_v20 = vld [vmem:[%s1037_s6] ss:$0 sm:$0xff]  ;;  %s753_s6 = smov [#allocation2]  }
 0x132   :  { %v324_v24 = vpop.f32.mrf.mxu1  ;;  %s586_s14 = sshll.u32 %s753_s6, 4  ;;  %s587_s14 = int_to_ptr.vmem [resolvable:$true] %s586_s14 }
 0x133   :  { %v234_v25 = vpack.c.bf16 %v220_v23, %v219_v22  ;;  %v325_v27 = vadd.f32 %v964_v58, %v324_v24 }
 0x135   :  { %363 = vmatmul.bf16.vlgmr.msrb.gmra.mxu3 %v234_v25  ;;  %v382_v32 = vmax.f32 %v325_v27, 0.0 }
 0x13a   :  { %v326_v28 = vpop.f32.mrf.mxu1 }
 0x13b   :  { %v327_v31 = vadd.f32 %v964_v58, %v326_v28 }
 0x13d   :  { %v383_v33 = vmax.f32 %v327_v31, 0.0 }
 0x13f   :  { %v405_v36 = vpack.c.bf16 %v383_v33, %v382_v32 }
 0x141   :  { %502 = vmatmul.bf16.gmra.mxu2 %v405_v36 }
 0x142   :  { %v329_v37 = vpop.f32.mrf.mxu1 }
 0x143   :  { %v330_v39 = vadd.f32 %v964_v58, %v329_v37 }
 0x145   :  { %368 = vmatmul.bf16.gmra.mxu3 %v235_v38  ;;  %v384_v44 = vmax.f32 %v330_v39, 0.0 }
 0x14a   :  { %v331_v42 = vpop.f32.mrf.mxu1 }
 0x14b   :  { %v332_v43 = vadd.f32 %v964_v58, %v331_v42 }
 0x14d   :  { %v385_v45 = vmax.f32 %v332_v43, 0.0 }
 0x14f   :  { %v406_v47 = vpack.c.bf16 %v385_v45, %v384_v44 }
 0x151   :  { %507 = vmatmul.bf16.gmra.mxu2 %v406_v47 }
 0x152   :  { %v334_v49 = vpop.f32.mrf.mxu1 }
 0x153   :  { %v335_v50 = vadd.f32 %v964_v58, %v334_v49 }
 0x155   :  { %373 = vmatmul.bf16.gmra.mxu3 %v236_v48  ;;  %v386_v53 = vmax.f32 %v335_v50, 0.0 }
 0x15a   :  { %v336_v51 = vpop.f32.mrf.mxu1 }
 0x15b   :  { %v337_v52 = vadd.f32 %v964_v58, %v336_v51 }
 0x15d   :  { %v387_v54 = vmax.f32 %v337_v52, 0.0 }
 0x15f   :  { %v407_v55 = vpack.c.bf16 %v387_v54, %v386_v53 }
 0x161   :  { %512 = vmatmul.bf16.gmra.mxu2 %v407_v55 }
 0x162   :  { %v339_v40 = vpop.f32.mrf.mxu1 }
 0x163   :  { %v340_v56 = vadd.f32 %v964_v58, %v339_v40 }
 0x165   :  { %v388_v60 = vmax.f32 %v340_v56, 0.0 }
 0x16a   :  { %v341_v57 = vpop.f32.mrf.mxu1 }
 0x16b   :  { %v342_v59 = vadd.f32 %v964_v58, %v341_v57 }
 0x16d   :  { %v389_v61 = vmax.f32 %v342_v59, 0.0 }
 0x16f   :  { %v408_v62 = vpack.c.bf16 %v389_v61, %v388_v60 }
 0x171   :  { %517 = vmatmul.bf16.gmra.mxu2 %v408_v62 }
 0x172   :  { %v344_v63 = vpop.f32.mrf.mxu1 }
 0x173   :  { %v345_v0 = vadd.f32 %v964_v58, %v344_v63 }
 0x175   :  { %v390_v3 = vmax.f32 %v345_v0, 0.0 }
 0x17a   :  { %v346_v1 = vpop.f32.mrf.mxu1 }
 0x17b   :  { %v347_v2 = vadd.f32 %v964_v58, %v346_v1 }
 0x17d   :  { %v391_v4 = vmax.f32 %v347_v2, 0.0 }
 0x17f   :  { %v409_v5 = vpack.c.bf16 %v391_v4, %v390_v3 }
 0x181   :  { %522 = vmatmul.bf16.gmra.mxu2 %v409_v5 }
 0x182   :  { %v349_v6 = vpop.f32.mrf.mxu1 }
 0x183   :  { %v350_v7 = vadd.f32 %v964_v58, %v349_v6 }
 0x185   :  { %v392_v10 = vmax.f32 %v350_v7, 0.0 }
 0x18a   :  { %v351_v8 = vpop.f32.mrf.mxu1 }
 0x18b   :  { %v352_v9 = vadd.f32 %v964_v58, %v351_v8 }
 0x18d   :  { %v393_v11 = vmax.f32 %v352_v9, 0.0 }
 0x18f   :  { %v410_v12 = vpack.c.bf16 %v393_v11, %v392_v10 }
 0x191   :  { %527 = vmatmul.bf16.gmra.mxu2 %v410_v12 }
 0x192   :  { %v354_v13 = vpop.f32.mrf.mxu1 }
 0x193   :  { %v355_v14 = vadd.f32 %v964_v58, %v354_v13 }
 0x195   :  { %v394_v17 = vmax.f32 %v355_v14, 0.0 }
 0x19a   :  { %v356_v15 = vpop.f32.mrf.mxu1 }
 0x19b   :  { %v357_v16 = vadd.f32 %v964_v58, %v356_v15 }
 0x19d   :  { %v395_v18 = vmax.f32 %v357_v16, 0.0 }
 0x19f   :  { %v411_v19 = vpack.c.bf16 %v395_v18, %v394_v17 }
 0x1a1   :  { %532 = vmatmul.bf16.gmra.mxu2 %v411_v19 }
 0x1a2   :  { %v359_v21 = vpop.f32.mrf.mxu1 }
 0x1a3   :  { %v360_v24 = vadd.f32 %v964_v58, %v359_v21 }
 0x1a4   :  { %v493_v22 = vpop.f32.mrf.mxu2 }
 0x1a5   :  { %v494_v23 = vadd.f32 %v994_v20, %v493_v22  ;;  %v396_v28 = vmax.f32 %v360_v24, 0.0 }
 0x1a7   :  { %557 = vst [vmem:[#allocation2] sm:$0xff] %v494_v23 }
 0x1aa   :  { %v361_v25 = vpop.f32.mrf.mxu1 }
 0x1ab   :  { %v362_v26 = vadd.f32 %v964_v58, %v361_v25 }
 0x1ac   :  { %v495_v27 = vpop.f32.mrf.mxu2 }
 0x1ad   :  { %v397_v29 = vmax.f32 %v362_v26, 0.0  ;;  %v496_v30 = vadd.f32 %v994_v20, %v495_v27 }
 0x1af   :  { %558 = vst [vmem:[#allocation2 + $0x8] sm:$0xff] %v496_v30  ;;  %v412_v31 = vpack.c.bf16 %v397_v29, %v396_v28 }
 0x1b1   :  { %537 = vmatmul.bf16.gmra.mxu2 %v412_v31 }
 0x1b4   :  { %v498_v32 = vpop.f32.mrf.mxu2 }
 0x1b5   :  { %v499_v33 = vadd.f32 %v994_v20, %v498_v32 }
 0x1b7   :  { %559 = vst [vmem:[#allocation2 + $0x10] sm:$0xff] %v499_v33 }
 0x1b8   :  { %v364_v34 = vpop.f32.mrf.mxu3 }
 0x1b9   :  { %v365_v37 = vadd.f32 %v964_v58, %v364_v34 }
 0x1bb   :  { %v398_v41 = vmax.f32 %v365_v37, 0.0 }
 0x1bc   :  { %v500_v35 = vpop.f32.mrf.mxu2 }
 0x1bd   :  { %v501_v36 = vadd.f32 %v994_v20, %v500_v35 }
 0x1bf   :  { %560 = vst [vmem:[#allocation2 + $0x18] sm:$0xff] %v501_v36 }
 0x1c0   :  { %v366_v38 = vpop.f32.mrf.mxu3 }
 0x1c1   :  { %v367_v39 = vadd.f32 %v964_v58, %v366_v38 }
 0x1c3   :  { %v399_v42 = vmax.f32 %v367_v39, 0.0 }
 0x1c4   :  { %v503_v43 = vpop.f32.mrf.mxu2 }
 0x1c5   :  { %v413_v44 = vpack.c.bf16 %v399_v42, %v398_v41  ;;  %v504_v45 = vadd.f32 %v994_v20, %v503_v43 }
 0x1c7   :  { %561 = vst [vmem:[#allocation2 + $0x20] sm:$0xff] %v504_v45  ;;  %542 = vmatmul.bf16.vlgmr.msra.gmra.mxu3 %v413_v44 }
 0x1c8   :  { %v369_v46 = vpop.f32.mrf.mxu3 }
 0x1c9   :  { %v370_v49 = vadd.f32 %v964_v58, %v369_v46 }
 0x1cb   :  { %v400_v52 = vmax.f32 %v370_v49, 0.0 }
 0x1cc   :  { %v505_v47 = vpop.f32.mrf.mxu2 }
 0x1cd   :  { %v506_v48 = vadd.f32 %v994_v20, %v505_v47 }
 0x1cf   :  { %562 = vst [vmem:[#allocation2 + $0x28] sm:$0xff] %v506_v48 }
 0x1d0   :  { %v371_v50 = vpop.f32.mrf.mxu3 }
 0x1d1   :  { %v372_v51 = vadd.f32 %v964_v58, %v371_v50 }
 0x1d3   :  { %v401_v53 = vmax.f32 %v372_v51, 0.0 }
 0x1d4   :  { %v508_v54 = vpop.f32.mrf.mxu2 }
 0x1d5   :  { %v509_v55 = vadd.f32 %v994_v20, %v508_v54  ;;  %v414_v40 = vpack.c.bf16 %v401_v53, %v400_v52 }
 0x1d7   :  { %563 = vst [vmem:[#allocation2 + $0x30] sm:$0xff] %v509_v55  ;;  %547 = vmatmul.bf16.gmra.mxu3 %v414_v40 }
 0x1d8   :  { %v374_v56 = vpop.f32.mrf.mxu3 }
 0x1d9   :  { %v375_v57 = vadd.f32 %v964_v58, %v374_v56 }
 0x1db   :  { %v402_v61 = vmax.f32 %v375_v57, 0.0 }
 0x1dc   :  { %v510_v59 = vpop.f32.mrf.mxu2 }
 0x1dd   :  { %v511_v60 = vadd.f32 %v994_v20, %v510_v59  ;;  %v415_v63 = vpack.c.bf16 %v402_v61, %v402_v61 }
 0x1df   :  { %564 = vst [vmem:[#allocation2 + $0x38] sm:$0xff] %v511_v60 }
 0x1e0   :  { %v376_v62 = vpop.f32.mrf.mxu3 }
 0x1e4   :  { %v513_v0 = vpop.f32.mrf.mxu2 }
 0x1e5   :  { %v514_v1 = vadd.f32 %v994_v20, %v513_v0 }
 0x1e7   :  { %565 = vst [vmem:[#allocation2 + $0x40] sm:$0xff] %v514_v1  ;;  %552 = vmatmul.bf16.gmra.mxu3 %v415_v63 }
 0x1ec   :  { %v515_v2 = vpop.f32.mrf.mxu2 }
 0x1ed   :  { %v516_v3 = vadd.f32 %v994_v20, %v515_v2 }
 0x1ef   :  { %566 = vst [vmem:[#allocation2 + $0x48] sm:$0xff] %v516_v3 }
 0x1f4   :  { %v518_v4 = vpop.f32.mrf.mxu2 }
 0x1f5   :  { %v519_v5 = vadd.f32 %v994_v20, %v518_v4 }
 0x1f7   :  { %567 = vst [vmem:[#allocation2 + $0x50] sm:$0xff] %v519_v5 }
 0x1fc   :  { %v520_v58 = vpop.f32.mrf.mxu2 }
 0x1fd   :  { %v521_v6 = vadd.f32 %v994_v20, %v520_v58 }
 0x1ff   :  { %568 = vst [vmem:[#allocation2 + $0x58] sm:$0xff] %v521_v6 }
 0x204   :  { %v523_v7 = vpop.f32.mrf.mxu2 }
 0x205   :  { %v524_v8 = vadd.f32 %v994_v20, %v523_v7 }
 0x207   :  { %569 = vst [vmem:[#allocation2 + $0x60] sm:$0xff] %v524_v8 }
 0x20c   :  { %v525_v9 = vpop.f32.mrf.mxu2 }
 0x20d   :  { %v526_v10 = vadd.f32 %v994_v20, %v525_v9 }
 0x20f   :  { %570 = vst [vmem:[#allocation2 + $0x68] sm:$0xff] %v526_v10 }
 0x214   :  { %v528_v11 = vpop.f32.mrf.mxu2 }
 0x215   :  { %v529_v12 = vadd.f32 %v994_v20, %v528_v11 }
 0x217   :  { %571 = vst [vmem:[#allocation2 + $0x70] sm:$0xff] %v529_v12 }
 0x21c   :  { %v530_v13 = vpop.f32.mrf.mxu2 }
 0x21d   :  { %v531_v14 = vadd.f32 %v994_v20, %v530_v13 }
 0x21f   :  { %572 = vst [vmem:[#allocation2 + $0x78] sm:$0xff] %v531_v14 }
 0x224   :  { %v533_v15 = vpop.f32.mrf.mxu2 }
 0x225   :  { %v534_v16 = vadd.f32 %v994_v20, %v533_v15 }
 0x227   :  { %573 = vst [vmem:[#allocation2 + $0x80] sm:$0xff] %v534_v16 }
 0x22c   :  { %v535_v17 = vpop.f32.mrf.mxu2 }
 0x22d   :  { %v536_v18 = vadd.f32 %v994_v20, %v535_v17 }
 0x22f   :  { %574 = vst [vmem:[#allocation2 + $0x88] sm:$0xff] %v536_v18 }
 0x234   :  { %v538_v19 = vpop.f32.mrf.mxu2 }
 0x235   :  { %v539_v21 = vadd.f32 %v994_v20, %v538_v19 }
 0x237   :  { %575 = vst [vmem:[#allocation2 + $0x90] sm:$0xff] %v539_v21 }
 0x23c   :  { %v540_v22 = vpop.f32.mrf.mxu2 }
 0x23d   :  { %v541_v23 = vadd.f32 %v994_v20, %v540_v22 }
 0x23f   :  { %576 = vst [vmem:[#allocation2 + $0x98] sm:$0xff] %v541_v23 }
 0x24a   :  { %v543_v24 = vpop.f32.mrf.mxu3 }
 0x24b   :  { %v544_v25 = vadd.f32 %v994_v20, %v543_v24 }
 0x24d   :  { %577 = vst [vmem:[#allocation2 + $0xa0] sm:$0xff] %v544_v25 }
 0x252   :  { %v545_v26 = vpop.f32.mrf.mxu3 }
 0x253   :  { %v546_v27 = vadd.f32 %v994_v20, %v545_v26 }
 0x255   :  { %578 = vst [vmem:[#allocation2 + $0xa8] sm:$0xff] %v546_v27 }
 0x25a   :  { %v548_v28 = vpop.f32.mrf.mxu3 }
 0x25b   :  { %v549_v29 = vadd.f32 %v994_v20, %v548_v28 }
 0x25d   :  { %579 = vst [vmem:[#allocation2 + $0xb0] sm:$0xff] %v549_v29 }
 0x262   :  { %v550_v30 = vpop.f32.mrf.mxu3 }
 0x263   :  { %v551_v31 = vadd.f32 %v994_v20, %v550_v30 }
 0x265   :  { %580 = vst [vmem:[#allocation2 + $0xb8] sm:$0xff] %v551_v31 }
 0x26a   :  { %v553_v32 = vpop.f32.mrf.mxu3 }
 0x26b   :  { %v554_v33 = vadd.f32 %v994_v20, %v553_v32 }
 0x26d   :  { %581 = vst [vmem:[#allocation2 + $0xc0] sm:$0xff] %v554_v33 }
 0x26e   :  { %594 = dma.vmem_to_hbm [thread:$0]  %s587_s14, 3200, %s589_s2, [#allocation3], %s754_s17, %s754_s17, %s755_s18  }
 0x272   :  { %v555_v34 = vpop.f32.mrf.mxu3 }
 0x273   :  { %751 = dma.done.wait [#allocation3], 3200  }
 0x274   :  { %752 = vsyncadd [#allocation3], 4294964096 }
 0x275   :  { %599 = vsyncpa [#allocation3], 1 }

// kernel: tpu_custom_call.1
= control target key start
LH: loop header
LB: loop body
LE: loop exit
PB: predicated region body
PF: predicated region fallthrough
CT: control target
= control target key end

     0   :  { %s1031_s0 = inlined_call_operand.vmem [shape: f32[200,32], index: 0, kind: input, shape index: {}]   ;;  %s1032_s1 = inlined_call_operand.vmem [shape: bf16[32,128], index: 1, kind: input, shape index: {}]   ;;  %s1033_s2 = inlined_call_operand.vmem [shape: f32[1,128], index: 2, kind: input, shape index: {}]   ;;  %s1034_s3 = inlined_call_operand.vmem [shape: bf16[128,128], index: 3, kind: input, shape index: {}]   ;;  %s1035_s4 = inlined_call_operand.vmem [shape: f32[1,128], index: 4, kind: input, shape index: {}]   ;;  %s1036_s5 = inlined_call_operand.vmem [shape: bf16[128,128], index: 5, kind: input, shape index: {}]   ;;  %s1037_s6 = inlined_call_operand.vmem [shape: f32[1,128], index: 6, kind: input, shape index: {}]   ;;  %s1038_s7 = inlined_call_operand.hbm [shape: f32[200,128], index: 7, kind: output, shape index: {}]  }
   0x1   :  { %v686_v0 = vld [vmem:[%s1032_s1 + $0x8] sm:$0xff]  ;;  %v685_v1 = vld [vmem:[%s1032_s1] sm:$0xff] }
   0x2   :  { %132 = vmatpush.bf16.msra.mxu0 %v686_v0  ;;  %v28_v2 = vld [vmem:[%s1031_s0] sm:$0xff]  ;;  %v29_v3 = vld [vmem:[%s1031_s0 + $0x8] sm:$0xff]  ;;  %703 = vmatpush.bf16.msra.mxu3 %v686_v0 }
   0x3   :  { %12 = vsyncpa [#allocation3], 0  ;;  %v53_v4 = vpack.c.bf16 %v29_v3, %v28_v2  ;;  %vm86_vm0 = vcmask 261120   ;;  %v30_v5 = vld [vmem:[%s1031_s0 + $0x10] sm:$0xff]  ;;  %v31_v6 = vld [vmem:[%s1031_s0 + $0x18] sm:$0xff]  ;;  %s754_s17 = smov 128  }
   0x4   :  { %v54_v7 = vpack.c.bf16 %v31_v6, %v30_v5  ;;  %v32_v8 = vld [vmem:[%s1031_s0 + $0x20] sm:$0xff]  ;;  %v33_v9 = vld [vmem:[%s1031_s0 + $0x28] sm:$0xff]  ;;  %v34_v11 = vld [vmem:[%s1031_s0 + $0x30] sm:$0xff]  ;;  %s755_s18 = smov 8  }
   0x5   :  { %v55_v10 = vpack.c.bf16 %v33_v9, %v32_v8  ;;  %v35_v12 = vld [vmem:[%s1031_s0 + $0x38] sm:$0xff]  ;;  %v36_v14 = vld [vmem:[%s1031_s0 + $0x40] sm:$0xff]  ;;  %v37_v15 = vld [vmem:[%s1031_s0 + $0x48] sm:$0xff] }
   0x6   :  { %133 = vmatpush.bf16.msra.mxu0 %v685_v1  ;;  %704 = vmatpush.bf16.msra.mxu3 %v685_v1  ;;  %v56_v13 = vpack.c.bf16 %v35_v12, %v34_v11  ;;  %v57_v16 = vpack.c.bf16 %v37_v15, %v36_v14  ;;  %v694_v17 = vld [vmem:[%s1034_s3 + $0x38] sm:$0xff]  ;;  %v38_v18 = vld [vmem:[%s1031_s0 + $0x50] sm:$0xff]  ;;  %v692_v22 = vld [vmem:[%s1034_s3 + $0x28] sm:$0xff] }
   0x7   :  { %305 = vmatpush.bf16.msra.mxu1 %v694_v17  ;;  %v39_v19 = vld [vmem:[%s1031_s0 + $0x58] sm:$0xff]  ;;  %v693_v21 = vld [vmem:[%s1034_s3 + $0x30] sm:$0xff]  ;;  %v691_v23 = vld [vmem:[%s1034_s3 + $0x20] sm:$0xff] }
   0x8   :  { %v58_v20 = vpack.c.bf16 %v39_v19, %v38_v18  ;;  %v40_v24 = vld [vmem:[%s1031_s0 + $0x60] sm:$0xff]  ;;  %v41_v25 = vld [vmem:[%s1031_s0 + $0x68] sm:$0xff]  ;;  %v690_v26 = vld [vmem:[%s1034_s3 + $0x18] sm:$0xff] }
   0x9   :  { %608 = vmatmul.msk.bf16.vlgmr.msra.gmra.mxu0 %vm86_vm0, %v53_v4  ;;  %v59_v27 = vpack.c.bf16 %v41_v25, %v40_v24  ;;  %v689_v28 = vld [vmem:[%s1034_s3 + $0x10] sm:$0xff]  ;;  %v688_v29 = vld [vmem:[%s1034_s3 + $0x8] sm:$0xff]  ;;  %v687_v30 = vld [vmem:[%s1034_s3] sm:$0xff] }
   0xa   :  { %705 = vmatpush.bf16.msrb.mxu3 %v694_v17  ;;  %v42_v31 = vld [vmem:[%s1031_s0 + $0x70] sm:$0xff]  ;;  %v43_v32 = vld [vmem:[%s1031_s0 + $0x78] sm:$0xff]  ;;  %v44_v34 = vld [vmem:[%s1031_s0 + $0x80] sm:$0xff] }
   0xb   :  { %306 = vmatpush.bf16.msra.mxu1 %v693_v21  ;;  %v60_v33 = vpack.c.bf16 %v43_v32, %v42_v31  ;;  %v45_v35 = vld [vmem:[%s1031_s0 + $0x88] sm:$0xff]  ;;  %v50_v38 = vld [vmem:[%s1031_s0 + $0xb0] sm:$0xff]  ;;  %v51_v39 = vld [vmem:[%s1031_s0 + $0xb8] sm:$0xff] }
   0xc   :  { %v61_v36 = vpack.c.bf16 %v45_v35, %v44_v34  ;;  %v897_v40 = vld [vmem:[%s1033_s2] ss:$0 sm:$0xff]  ;;  %v64_v41 = vpack.c.bf16 %v51_v39, %v50_v38  ;;  %v46_v47 = vld [vmem:[%s1031_s0 + $0x90] sm:$0xff]  ;;  %v47_v48 = vld [vmem:[%s1031_s0 + $0x98] sm:$0xff]  ;;  %s588_s2 = sshll.u32 %s1038_s7, 4  ;;  %s589_s2 = int_to_ptr.hbm [resolvable:$true] %s588_s2 }
   0xd   :  { %v62_v50 = vpack.c.bf16 %v47_v48, %v46_v47  ;;  %v48_v57 = vld [vmem:[%s1031_s0 + $0xa0] sm:$0xff]  ;;  %v49_v58 = vld [vmem:[%s1031_s0 + $0xa8] sm:$0xff]  ;;  %v702_v24 = vld [vmem:[%s1036_s5 + $0x38] sm:$0xff] }
   0xe   :  { %706 = vmatpush.bf16.msrb.mxu3 %v693_v21  ;;  %v63_v60 = vpack.c.bf16 %v49_v58, %v48_v57  ;;  %v52_v62 = vld [vmem:[%s1031_s0 + $0xc0] sm:$0xff]  ;;  %484 = vmatpush.bf16.msra.mxu2 %v702_v24  ;;  %v698_v35 = vld [vmem:[%s1036_s5 + $0x18] sm:$0xff]  ;;  %v697_v39 = vld [vmem:[%s1036_s5 + $0x10] sm:$0xff] }
   0xf   :  { %307 = vmatpush.bf16.msra.mxu1 %v692_v22  ;;  %619 = vmatmul.msk.bf16.vlgmr.msra.gmra.mxu3 %vm86_vm0, %v64_v41  ;;  %v65_v63 = vpack.c.bf16 %v52_v62, %v52_v62  ;;  %v699_v31 = vld [vmem:[%s1036_s5 + $0x20] sm:$0xff] }
  0x10   :  { %v964_v58 = vld [vmem:[%s1035_s4] ss:$0 sm:$0xff] }
  0x12   :  { %707 = vmatpush.bf16.msrb.mxu3 %v692_v22 }
  0x13   :  { %308 = vmatpush.bf16.msra.mxu1 %v691_v23 }
  0x16   :  { %708 = vmatpush.bf16.msrb.mxu3 %v691_v23 }
  0x17   :  { %309 = vmatpush.bf16.msra.mxu1 %v690_v26 }
  0x19   :  { %609 = vmatmul.msk.bf16.gmra.mxu0 %vm86_vm0, %v54_v7 }
  0x1a   :  { %709 = vmatpush.bf16.msrb.mxu3 %v690_v26 }
  0x1b   :  { %310 = vmatpush.bf16.msra.mxu1 %v689_v28 }
  0x1e   :  { %710 = vmatpush.bf16.msrb.mxu3 %v689_v28  ;;  %v701_v28 = vld [vmem:[%s1036_s5 + $0x30] sm:$0xff] }
  0x1f   :  { %311 = vmatpush.bf16.msra.mxu1 %v688_v29  ;;  %620 = vmatmul.msk.bf16.gmra.mxu3 %vm86_vm0, %v65_v63 }
  0x20   :  { %485 = vmatpush.bf16.msra.mxu2 %v701_v28 }
  0x22   :  { %711 = vmatpush.bf16.msrb.mxu3 %v688_v29 }
  0x23   :  { %312 = vmatpush.bf16.msra.mxu1 %v687_v30 }
  0x26   :  { %712 = vmatpush.bf16.msrb.mxu3 %v687_v30  ;;  %v700_v30 = vld [vmem:[%s1036_s5 + $0x28] sm:$0xff] }
  0x27   :  { %486 = vmatpush.bf16.msra.mxu2 %v700_v30 }
  0x29   :  { %610 = vmatmul.msk.bf16.gmra.mxu0 %vm86_vm0, %v55_v10 }
  0x2a   :  { %713 = vmatpush.bf16.msra.mxu3 %v702_v24 }
  0x2b   :  { %487 = vmatpush.bf16.msra.mxu2 %v699_v31 }
  0x2e   :  { %714 = vmatpush.bf16.msra.mxu3 %v701_v28 }
  0x2f   :  { %488 = vmatpush.bf16.msra.mxu2 %v698_v35 }
  0x32   :  { %715 = vmatpush.bf16.msra.mxu3 %v700_v30 }
  0x33   :  { %489 = vmatpush.bf16.msra.mxu2 %v697_v39 }
  0x36   :  { %716 = vmatpush.bf16.msra.mxu3 %v699_v31 }
  0x39   :  { %611 = vmatmul.msk.bf16.gmra.mxu0 %vm86_vm0, %v56_v13 }
  0x3a   :  { %717 = vmatpush.bf16.msra.mxu3 %v698_v35 }
  0x3e   :  { %718 = vmatpush.bf16.msra.mxu3 %v697_v39 }
  0x49   :  { %612 = vmatmul.msk.bf16.gmra.mxu0 %vm86_vm0, %v57_v16 }
  0x59   :  { %613 = vmatmul.msk.bf16.gmra.mxu0 %vm86_vm0, %v58_v20 }
  0x69   :  { %614 = vmatmul.msk.bf16.gmra.mxu0 %vm86_vm0, %v59_v27 }
  0x79   :  { %615 = vmatmul.msk.bf16.gmra.mxu0 %vm86_vm0, %v60_v33 }
  0x86   :  { %v135_v37 = vpop.f32.mrf.mxu0 }
  0x87   :  { %v136_v42 = vadd.f32 %v897_v40, %v135_v37 }
  0x89   :  { %616 = vmatmul.msk.bf16.gmra.mxu0 %vm86_vm0, %v61_v36  ;;  %v199_v45 = vmax.f32 %v136_v42, 0.0  ;;  %v696_v42 = vld [vmem:[%s1036_s5 + $0x8] sm:$0xff] }
  0x8a   :  { %490 = vmatpush.bf16.msra.mxu2 %v696_v42  ;;  %719 = vmatpush.bf16.msra.mxu3 %v696_v42 }
  0x8e   :  { %v137_v43 = vpop.f32.mrf.mxu0 }
  0x8f   :  { %v138_v44 = vadd.f32 %v897_v40, %v137_v43  ;;  %v695_v43 = vld [vmem:[%s1036_s5] sm:$0xff] }
  0x90   :  { %491 = vmatpush.bf16.msra.mxu2 %v695_v43  ;;  %720 = vmatpush.bf16.msra.mxu3 %v695_v43 }
  0x91   :  { %v200_v46 = vmax.f32 %v138_v44, 0.0 }
  0x92   :  { %v190_v63 = vpop.f32.mrf.mxu3 }
  0x93   :  { %v224_v49 = vpack.c.bf16 %v200_v46, %v199_v45 }
  0x95   :  { %313 = vmatmul.bf16.vlgmr.msra.gmra.mxu1 %v224_v49 }
  0x96   :  { %v140_v51 = vpop.f32.mrf.mxu0 }
  0x97   :  { %v141_v52 = vadd.f32 %v897_v40, %v140_v51 }
  0x99   :  { %617 = vmatmul.msk.bf16.gmra.mxu0 %vm86_vm0, %v62_v50  ;;  %v201_v55 = vmax.f32 %v141_v52, 0.0 }
  0x9e   :  { %v142_v53 = vpop.f32.mrf.mxu0 }
  0x9f   :  { %v143_v54 = vadd.f32 %v897_v40, %v142_v53 }
  0xa1   :  { %v202_v56 = vmax.f32 %v143_v54, 0.0 }
  0xa3   :  { %v225_v59 = vpack.c.bf16 %v202_v56, %v201_v55 }
  0xa5   :  { %318 = vmatmul.bf16.gmra.mxu1 %v225_v59 }
  0xa6   :  { %v145_v61 = vpop.f32.mrf.mxu0 }
  0xa7   :  { %v146_v0 = vadd.f32 %v897_v40, %v145_v61 }
  0xa9   :  { %618 = vmatmul.msk.bf16.gmra.mxu0 %vm86_vm0, %v63_v60  ;;  %v203_v3 = vmax.f32 %v146_v0, 0.0 }
  0xae   :  { %v147_v1 = vpop.f32.mrf.mxu0 }
  0xaf   :  { %v148_v2 = vadd.f32 %v897_v40, %v147_v1 }
  0xb1   :  { %v204_v4 = vmax.f32 %v148_v2, 0.0 }
  0xb3   :  { %v226_v5 = vpack.c.bf16 %v204_v4, %v203_v3 }
  0xb5   :  { %323 = vmatmul.bf16.gmra.mxu1 %v226_v5 }
  0xb6   :  { %v150_v6 = vpop.f32.mrf.mxu0 }
  0xb7   :  { %v151_v7 = vadd.f32 %v897_v40, %v150_v6 }
  0xb9   :  { %v205_v10 = vmax.f32 %v151_v7, 0.0 }
  0xbe   :  { %v152_v8 = vpop.f32.mrf.mxu0 }
  0xbf   :  { %v153_v9 = vadd.f32 %v897_v40, %v152_v8 }
  0xc1   :  { %v206_v11 = vmax.f32 %v153_v9, 0.0 }
  0xc3   :  { %v227_v12 = vpack.c.bf16 %v206_v11, %v205_v10  ;;  %v192_v11 = vpop.f32.mrf.mxu3 }
  0xc4   :  { %v193_v30 = vadd.f32 %v897_v40, %v192_v11 }
  0xc5   :  { %328 = vmatmul.bf16.gmra.mxu1 %v227_v12 }
  0xc6   :  { %v155_v13 = vpop.f32.mrf.mxu0  ;;  %v222_v35 = vmax.f32 %v193_v30, 0.0 }
  0xc7   :  { %v156_v14 = vadd.f32 %v897_v40, %v155_v13 }
  0xc9   :  { %v207_v17 = vmax.f32 %v156_v14, 0.0 }
  0xce   :  { %v157_v15 = vpop.f32.mrf.mxu0 }
  0xcf   :  { %v158_v16 = vadd.f32 %v897_v40, %v157_v15 }
  0xd1   :  { %v208_v18 = vmax.f32 %v158_v16, 0.0 }
  0xd3   :  { %v228_v19 = vpack.c.bf16 %v208_v18, %v207_v17 }
  0xd5   :  { %333 = vmatmul.bf16.gmra.mxu1 %v228_v19  ;;  %v195_v19 = vpop.f32.mrf.mxu3 }
  0xd6   :  { %v160_v20 = vpop.f32.mrf.mxu0 }
  0xd7   :  { %v161_v21 = vadd.f32 %v897_v40, %v160_v20 }
  0xd9   :  { %v209_v25 = vmax.f32 %v161_v21, 0.0 }
  0xde   :  { %v162_v22 = vpop.f32.mrf.mxu0 }
  0xdf   :  { %v163_v23 = vadd.f32 %v897_v40, %v162_v22 }
  0xe1   :  { %v210_v26 = vmax.f32 %v163_v23, 0.0 }
  0xe3   :  { %v229_v27 = vpack.c.bf16 %v210_v26, %v209_v25  ;;  %v197_v26 = vpop.f32.mrf.mxu3 }
  0xe5   :  { %338 = vmatmul.bf16.gmra.mxu1 %v229_v27 }
  0xe6   :  { %v165_v29 = vpop.f32.mrf.mxu0 }
  0xe7   :  { %v166_v32 = vadd.f32 %v897_v40, %v165_v29  ;;  %v191_v29 = vadd.f32 %v897_v40, %v190_v63 }
  0xe9   :  { %v211_v36 = vmax.f32 %v166_v32, 0.0 }
  0xee   :  { %v167_v33 = vpop.f32.mrf.mxu0 }
  0xef   :  { %v168_v34 = vadd.f32 %v897_v40, %v167_v33 }
  0xf1   :  { %v212_v37 = vmax.f32 %v168_v34, 0.0  ;;  %v221_v34 = vmax.f32 %v191_v29, 0.0 }
  0xf3   :  { %v230_v38 = vpack.c.bf16 %v212_v37, %v211_v36 }
  0xf5   :  { %343 = vmatmul.bf16.gmra.mxu1 %v230_v38  ;;  %v235_v38 = vpack.c.bf16 %v222_v35, %v221_v34 }
  0xf6   :  { %v170_v41 = vpop.f32.mrf.mxu0 }
  0xf7   :  { %v171_v44 = vadd.f32 %v897_v40, %v170_v41  ;;  %v196_v41 = vadd.f32 %v897_v40, %v195_v19 }
  0xf9   :  { %v213_v47 = vmax.f32 %v171_v44, 0.0 }
  0xfe   :  { %v172_v45 = vpop.f32.mrf.mxu0 }
  0xff   :  { %v173_v46 = vadd.f32 %v897_v40, %v172_v45 }
 0x101   :  { %v214_v48 = vmax.f32 %v173_v46, 0.0  ;;  %v223_v46 = vmax.f32 %v196_v41, 0.0 }
 0x103   :  { %v231_v49 = vpack.c.bf16 %v214_v48, %v213_v47  ;;  %v236_v48 = vpack.c.bf16 %v223_v46, %v223_v46 }
 0x105   :  { %348 = vmatmul.bf16.gmra.mxu1 %v231_v49 }
 0x106   :  { %v175_v50 = vpop.f32.mrf.mxu0 }
 0x107   :  { %v176_v51 = vadd.f32 %v897_v40, %v175_v50 }
 0x109   :  { %v215_v54 = vmax.f32 %v176_v51, 0.0 }
 0x10e   :  { %v177_v52 = vpop.f32.mrf.mxu0 }
 0x10f   :  { %v178_v53 = vadd.f32 %v897_v40, %v177_v52 }
 0x111   :  { %v216_v55 = vmax.f32 %v178_v53, 0.0 }
 0x112   :  { %v314_v56 = vpop.f32.mrf.mxu1 }
 0x113   :  { %v232_v57 = vpack.c.bf16 %v216_v55, %v215_v54  ;;  %v315_v60 = vadd.f32 %v964_v58, %v314_v56 }
 0x115   :  { %353 = vmatmul.bf16.gmra.mxu1 %v232_v57  ;;  %v378_v0 = vmax.f32 %v315_v60, 0.0 }
 0x116   :  { %v180_v59 = vpop.f32.mrf.mxu0 }
 0x117   :  { %v181_v1 = vadd.f32 %v897_v40, %v180_v59 }
 0x119   :  { %v217_v6 = vmax.f32 %v181_v1, 0.0 }
 0x11a   :  { %v316_v61 = vpop.f32.mrf.mxu1 }
 0x11b   :  { %v317_v62 = vadd.f32 %v964_v58, %v316_v61 }
 0x11d   :  { %v379_v2 = vmax.f32 %v317_v62, 0.0 }
 0x11e   :  { %v182_v3 = vpop.f32.mrf.mxu0 }
 0x11f   :  { %v183_v4 = vadd.f32 %v897_v40, %v182_v3  ;;  %v403_v5 = vpack.c.bf16 %v379_v2, %v378_v0 }
 0x121   :  { %v218_v7 = vmax.f32 %v183_v4, 0.0  ;;  %492 = vmatmul.bf16.vlgmr.msra.gmra.mxu2 %v403_v5 }
 0x122   :  { %v319_v8 = vpop.f32.mrf.mxu1 }
 0x123   :  { %v233_v9 = vpack.c.bf16 %v218_v7, %v217_v6  ;;  %v320_v12 = vadd.f32 %v964_v58, %v319_v8 }
 0x125   :  { %358 = vmatmul.bf16.gmra.mxu1 %v233_v9  ;;  %v380_v15 = vmax.f32 %v320_v12, 0.0 }
 0x126   :  { %v185_v10 = vpop.f32.mrf.mxu0 }
 0x127   :  { %v186_v16 = vadd.f32 %v897_v40, %v185_v10 }
 0x129   :  { %v219_v22 = vmax.f32 %v186_v16, 0.0 }
 0x12a   :  { %v321_v13 = vpop.f32.mrf.mxu1 }
 0x12b   :  { %v322_v14 = vadd.f32 %v964_v58, %v321_v13 }
 0x12d   :  { %v381_v17 = vmax.f32 %v322_v14, 0.0 }
 0x12e   :  { %v187_v18 = vpop.f32.mrf.mxu0 }
 0x12f   :  { %v188_v20 = vadd.f32 %v897_v40, %v187_v18  ;;  %v404_v21 = vpack.c.bf16 %v381_v17, %v380_v15 }
 0x131   :  { %v220_v23 = vmax.f32 %v188_v20, 0.0  ;;  %497 = vmatmul.bf16.gmra.mxu2 %v404_v21  ;;  %v994_v20 = vld [vmem:[%s1037_s6] ss:$0 sm:$0xff]  ;;  %s753_s6 = smov [#allocation2]  }
 0x132   :  { %v324_v24 = vpop.f32.mrf.mxu1  ;;  %s586_s14 = sshll.u32 %s753_s6, 4  ;;  %s587_s14 = int_to_ptr.vmem [resolvable:$true] %s586_s14 }
 0x133   :  { %v234_v25 = vpack.c.bf16 %v220_v23, %v219_v22  ;;  %v325_v27 = vadd.f32 %v964_v58, %v324_v24 }
 0x135   :  { %363 = vmatmul.bf16.vlgmr.msrb.gmra.mxu3 %v234_v25  ;;  %v382_v32 = vmax.f32 %v325_v27, 0.0 }
 0x13a   :  { %v326_v28 = vpop.f32.mrf.mxu1 }
 0x13b   :  { %v327_v31 = vadd.f32 %v964_v58, %v326_v28 }
 0x13d   :  { %v383_v33 = vmax.f32 %v327_v31, 0.0 }
 0x13f   :  { %v405_v36 = vpack.c.bf16 %v383_v33, %v382_v32 }
 0x141   :  { %502 = vmatmul.bf16.gmra.mxu2 %v405_v36 }
 0x142   :  { %v329_v37 = vpop.f32.mrf.mxu1 }
 0x143   :  { %v330_v39 = vadd.f32 %v964_v58, %v329_v37 }
 0x145   :  { %368 = vmatmul.bf16.gmra.mxu3 %v235_v38  ;;  %v384_v44 = vmax.f32 %v330_v39, 0.0 }
 0x14a   :  { %v331_v42 = vpop.f32.mrf.mxu1 }
 0x14b   :  { %v332_v43 = vadd.f32 %v964_v58, %v331_v42 }
 0x14d   :  { %v385_v45 = vmax.f32 %v332_v43, 0.0 }
 0x14f   :  { %v406_v47 = vpack.c.bf16 %v385_v45, %v384_v44 }
 0x151   :  { %507 = vmatmul.bf16.gmra.mxu2 %v406_v47 }
 0x152   :  { %v334_v49 = vpop.f32.mrf.mxu1 }
 0x153   :  { %v335_v50 = vadd.f32 %v964_v58, %v334_v49 }
 0x155   :  { %373 = vmatmul.bf16.gmra.mxu3 %v236_v48  ;;  %v386_v53 = vmax.f32 %v335_v50, 0.0 }
 0x15a   :  { %v336_v51 = vpop.f32.mrf.mxu1 }
 0x15b   :  { %v337_v52 = vadd.f32 %v964_v58, %v336_v51 }
 0x15d   :  { %v387_v54 = vmax.f32 %v337_v52, 0.0 }
 0x15f   :  { %v407_v55 = vpack.c.bf16 %v387_v54, %v386_v53 }
 0x161   :  { %512 = vmatmul.bf16.gmra.mxu2 %v407_v55 }
 0x162   :  { %v339_v40 = vpop.f32.mrf.mxu1 }
 0x163   :  { %v340_v56 = vadd.f32 %v964_v58, %v339_v40 }
 0x165   :  { %v388_v60 = vmax.f32 %v340_v56, 0.0 }
 0x16a   :  { %v341_v57 = vpop.f32.mrf.mxu1 }
 0x16b   :  { %v342_v59 = vadd.f32 %v964_v58, %v341_v57 }
 0x16d   :  { %v389_v61 = vmax.f32 %v342_v59, 0.0 }
 0x16f   :  { %v408_v62 = vpack.c.bf16 %v389_v61, %v388_v60 }
 0x171   :  { %517 = vmatmul.bf16.gmra.mxu2 %v408_v62 }
 0x172   :  { %v344_v63 = vpop.f32.mrf.mxu1 }
 0x173   :  { %v345_v0 = vadd.f32 %v964_v58, %v344_v63 }
 0x175   :  { %v390_v3 = vmax.f32 %v345_v0, 0.0 }
 0x17a   :  { %v346_v1 = vpop.f32.mrf.mxu1 }
 0x17b   :  { %v347_v2 = vadd.f32 %v964_v58, %v346_v1 }
 0x17d   :  { %v391_v4 = vmax.f32 %v347_v2, 0.0 }
 0x17f   :  { %v409_v5 = vpack.c.bf16 %v391_v4, %v390_v3 }
 0x181   :  { %522 = vmatmul.bf16.gmra.mxu2 %v409_v5 }
 0x182   :  { %v349_v6 = vpop.f32.mrf.mxu1 }
 0x183   :  { %v350_v7 = vadd.f32 %v964_v58, %v349_v6 }
 0x185   :  { %v392_v10 = vmax.f32 %v350_v7, 0.0 }
 0x18a   :  { %v351_v8 = vpop.f32.mrf.mxu1 }
 0x18b   :  { %v352_v9 = vadd.f32 %v964_v58, %v351_v8 }
 0x18d   :  { %v393_v11 = vmax.f32 %v352_v9, 0.0 }
 0x18f   :  { %v410_v12 = vpack.c.bf16 %v393_v11, %v392_v10 }
 0x191   :  { %527 = vmatmul.bf16.gmra.mxu2 %v410_v12 }
 0x192   :  { %v354_v13 = vpop.f32.mrf.mxu1 }
 0x193   :  { %v355_v14 = vadd.f32 %v964_v58, %v354_v13 }
 0x195   :  { %v394_v17 = vmax.f32 %v355_v14, 0.0 }
 0x19a   :  { %v356_v15 = vpop.f32.mrf.mxu1 }
 0x19b   :  { %v357_v16 = vadd.f32 %v964_v58, %v356_v15 }
 0x19d   :  { %v395_v18 = vmax.f32 %v357_v16, 0.0 }
 0x19f   :  { %v411_v19 = vpack.c.bf16 %v395_v18, %v394_v17 }
 0x1a1   :  { %532 = vmatmul.bf16.gmra.mxu2 %v411_v19 }
 0x1a2   :  { %v359_v21 = vpop.f32.mrf.mxu1 }
 0x1a3   :  { %v360_v24 = vadd.f32 %v964_v58, %v359_v21 }
 0x1a4   :  { %v493_v22 = vpop.f32.mrf.mxu2 }
 0x1a5   :  { %v494_v23 = vadd.f32 %v994_v20, %v493_v22  ;;  %v396_v28 = vmax.f32 %v360_v24, 0.0 }
 0x1a7   :  { %557 = vst [vmem:[#allocation2] sm:$0xff] %v494_v23 }
 0x1aa   :  { %v361_v25 = vpop.f32.mrf.mxu1 }
 0x1ab   :  { %v362_v26 = vadd.f32 %v964_v58, %v361_v25 }
 0x1ac   :  { %v495_v27 = vpop.f32.mrf.mxu2 }
 0x1ad   :  { %v397_v29 = vmax.f32 %v362_v26, 0.0  ;;  %v496_v30 = vadd.f32 %v994_v20, %v495_v27 }
 0x1af   :  { %558 = vst [vmem:[#allocation2 + $0x8] sm:$0xff] %v496_v30  ;;  %v412_v31 = vpack.c.bf16 %v397_v29, %v396_v28 }
 0x1b1   :  { %537 = vmatmul.bf16.gmra.mxu2 %v412_v31 }
 0x1b4   :  { %v498_v32 = vpop.f32.mrf.mxu2 }
 0x1b5   :  { %v499_v33 = vadd.f32 %v994_v20, %v498_v32 }
 0x1b7   :  { %559 = vst [vmem:[#allocation2 + $0x10] sm:$0xff] %v499_v33 }
 0x1b8   :  { %v364_v34 = vpop.f32.mrf.mxu3 }
 0x1b9   :  { %v365_v37 = vadd.f32 %v964_v58, %v364_v34 }
 0x1bb   :  { %v398_v41 = vmax.f32 %v365_v37, 0.0 }
 0x1bc   :  { %v500_v35 = vpop.f32.mrf.mxu2 }
 0x1bd   :  { %v501_v36 = vadd.f32 %v994_v20, %v500_v35 }
 0x1bf   :  { %560 = vst [vmem:[#allocation2 + $0x18] sm:$0xff] %v501_v36 }
 0x1c0   :  { %v366_v38 = vpop.f32.mrf.mxu3 }
 0x1c1   :  { %v367_v39 = vadd.f32 %v964_v58, %v366_v38 }
 0x1c3   :  { %v399_v42 = vmax.f32 %v367_v39, 0.0 }
 0x1c4   :  { %v503_v43 = vpop.f32.mrf.mxu2 }
 0x1c5   :  { %v413_v44 = vpack.c.bf16 %v399_v42, %v398_v41  ;;  %v504_v45 = vadd.f32 %v994_v20, %v503_v43 }
 0x1c7   :  { %561 = vst [vmem:[#allocation2 + $0x20] sm:$0xff] %v504_v45  ;;  %542 = vmatmul.bf16.vlgmr.msra.gmra.mxu3 %v413_v44 }
 0x1c8   :  { %v369_v46 = vpop.f32.mrf.mxu3 }
 0x1c9   :  { %v370_v49 = vadd.f32 %v964_v58, %v369_v46 }
 0x1cb   :  { %v400_v52 = vmax.f32 %v370_v49, 0.0 }
 0x1cc   :  { %v505_v47 = vpop.f32.mrf.mxu2 }
 0x1cd   :  { %v506_v48 = vadd.f32 %v994_v20, %v505_v47 }
 0x1cf   :  { %562 = vst [vmem:[#allocation2 + $0x28] sm:$0xff] %v506_v48 }
 0x1d0   :  { %v371_v50 = vpop.f32.mrf.mxu3 }
 0x1d1   :  { %v372_v51 = vadd.f32 %v964_v58, %v371_v50 }
 0x1d3   :  { %v401_v53 = vmax.f32 %v372_v51, 0.0 }
 0x1d4   :  { %v508_v54 = vpop.f32.mrf.mxu2 }
 0x1d5   :  { %v509_v55 = vadd.f32 %v994_v20, %v508_v54  ;;  %v414_v40 = vpack.c.bf16 %v401_v53, %v400_v52 }
 0x1d7   :  { %563 = vst [vmem:[#allocation2 + $0x30] sm:$0xff] %v509_v55  ;;  %547 = vmatmul.bf16.gmra.mxu3 %v414_v40 }
 0x1d8   :  { %v374_v56 = vpop.f32.mrf.mxu3 }
 0x1d9   :  { %v375_v57 = vadd.f32 %v964_v58, %v374_v56 }
 0x1db   :  { %v402_v61 = vmax.f32 %v375_v57, 0.0 }
 0x1dc   :  { %v510_v59 = vpop.f32.mrf.mxu2 }
 0x1dd   :  { %v511_v60 = vadd.f32 %v994_v20, %v510_v59  ;;  %v415_v63 = vpack.c.bf16 %v402_v61, %v402_v61 }
 0x1df   :  { %564 = vst [vmem:[#allocation2 + $0x38] sm:$0xff] %v511_v60 }
 0x1e0   :  { %v376_v62 = vpop.f32.mrf.mxu3 }
 0x1e4   :  { %v513_v0 = vpop.f32.mrf.mxu2 }
 0x1e5   :  { %v514_v1 = vadd.f32 %v994_v20, %v513_v0 }
 0x1e7   :  { %565 = vst [vmem:[#allocation2 + $0x40] sm:$0xff] %v514_v1  ;;  %552 = vmatmul.bf16.gmra.mxu3 %v415_v63 }
 0x1ec   :  { %v515_v2 = vpop.f32.mrf.mxu2 }
 0x1ed   :  { %v516_v3 = vadd.f32 %v994_v20, %v515_v2 }
 0x1ef   :  { %566 = vst [vmem:[#allocation2 + $0x48] sm:$0xff] %v516_v3 }
 0x1f4   :  { %v518_v4 = vpop.f32.mrf.mxu2 }
 0x1f5   :  { %v519_v5 = vadd.f32 %v994_v20, %v518_v4 }
 0x1f7   :  { %567 = vst [vmem:[#allocation2 + $0x50] sm:$0xff] %v519_v5 }
 0x1fc   :  { %v520_v58 = vpop.f32.mrf.mxu2 }
 0x1fd   :  { %v521_v6 = vadd.f32 %v994_v20, %v520_v58 }
 0x1ff   :  { %568 = vst [vmem:[#allocation2 + $0x58] sm:$0xff] %v521_v6 }
 0x204   :  { %v523_v7 = vpop.f32.mrf.mxu2 }
 0x205   :  { %v524_v8 = vadd.f32 %v994_v20, %v523_v7 }
 0x207   :  { %569 = vst [vmem:[#allocation2 + $0x60] sm:$0xff] %v524_v8 }
 0x20c   :  { %v525_v9 = vpop.f32.mrf.mxu2 }
 0x20d   :  { %v526_v10 = vadd.f32 %v994_v20, %v525_v9 }
 0x20f   :  { %570 = vst [vmem:[#allocation2 + $0x68] sm:$0xff] %v526_v10 }
 0x214   :  { %v528_v11 = vpop.f32.mrf.mxu2 }
 0x215   :  { %v529_v12 = vadd.f32 %v994_v20, %v528_v11 }
 0x217   :  { %571 = vst [vmem:[#allocation2 + $0x70] sm:$0xff] %v529_v12 }
 0x21c   :  { %v530_v13 = vpop.f32.mrf.mxu2 }
 0x21d   :  { %v531_v14 = vadd.f32 %v994_v20, %v530_v13 }
 0x21f   :  { %572 = vst [vmem:[#allocation2 + $0x78] sm:$0xff] %v531_v14 }
 0x224   :  { %v533_v15 = vpop.f32.mrf.mxu2 }
 0x225   :  { %v534_v16 = vadd.f32 %v994_v20, %v533_v15 }
 0x227   :  { %573 = vst [vmem:[#allocation2 + $0x80] sm:$0xff] %v534_v16 }
 0x22c   :  { %v535_v17 = vpop.f32.mrf.mxu2 }
 0x22d   :  { %v536_v18 = vadd.f32 %v994_v20, %v535_v17 }
 0x22f   :  { %574 = vst [vmem:[#allocation2 + $0x88] sm:$0xff] %v536_v18 }
 0x234   :  { %v538_v19 = vpop.f32.mrf.mxu2 }
 0x235   :  { %v539_v21 = vadd.f32 %v994_v20, %v538_v19 }
 0x237   :  { %575 = vst [vmem:[#allocation2 + $0x90] sm:$0xff] %v539_v21 }
 0x23c   :  { %v540_v22 = vpop.f32.mrf.mxu2 }
 0x23d   :  { %v541_v23 = vadd.f32 %v994_v20, %v540_v22 }
 0x23f   :  { %576 = vst [vmem:[#allocation2 + $0x98] sm:$0xff] %v541_v23 }
 0x24a   :  { %v543_v24 = vpop.f32.mrf.mxu3 }
 0x24b   :  { %v544_v25 = vadd.f32 %v994_v20, %v543_v24 }
 0x24d   :  { %577 = vst [vmem:[#allocation2 + $0xa0] sm:$0xff] %v544_v25 }
 0x252   :  { %v545_v26 = vpop.f32.mrf.mxu3 }
 0x253   :  { %v546_v27 = vadd.f32 %v994_v20, %v545_v26 }
 0x255   :  { %578 = vst [vmem:[#allocation2 + $0xa8] sm:$0xff] %v546_v27 }
 0x25a   :  { %v548_v28 = vpop.f32.mrf.mxu3 }
 0x25b   :  { %v549_v29 = vadd.f32 %v994_v20, %v548_v28 }
 0x25d   :  { %579 = vst [vmem:[#allocation2 + $0xb0] sm:$0xff] %v549_v29 }
 0x262   :  { %v550_v30 = vpop.f32.mrf.mxu3 }
 0x263   :  { %v551_v31 = vadd.f32 %v994_v20, %v550_v30 }
 0x265   :  { %580 = vst [vmem:[#allocation2 + $0xb8] sm:$0xff] %v551_v31 }
 0x26a   :  { %v553_v32 = vpop.f32.mrf.mxu3 }
 0x26b   :  { %v554_v33 = vadd.f32 %v994_v20, %v553_v32 }
 0x26d   :  { %581 = vst [vmem:[#allocation2 + $0xc0] sm:$0xff] %v554_v33 }
 0x26e   :  { %594 = dma.vmem_to_hbm [thread:$0]  %s587_s14, 3200, %s589_s2, [#allocation3], %s754_s17, %s754_s17, %s755_s18  }
 0x272   :  { %v555_v34 = vpop.f32.mrf.mxu3 }
 0x273   :  { %751 = dma.done.wait [#allocation3], 3200  }
 0x274   :  { %752 = vsyncadd [#allocation3], 4294964096 }
 0x275   :  { %599 = vsyncpa [#allocation3], 1 }

</bundles_post_ra>
